<compile_context>
chip_gen: v5e
topology: v5e:2x2
jax: 0.10.0
libtpu: 0.0.40
codegen_flags: <defaults>
</compile_context>

<pallas_src>
import functools

import jax
import jax.numpy as jnp
import numpy as np
from jax.experimental import pallas as pl
from jax.experimental.pallas import tpu as pltpu

_BN_EPS = 1e-5


def _round_up(x, m):
    return ((x + m - 1) // m) * m


def _fold_conv_bn(p):
    """Fold inference BatchNorm into the conv weight and a per-channel bias."""
    scale = p['gamma'] / jnp.sqrt(p['var'] + _BN_EPS)
    return p['w'] * scale, p['beta'] - p['mean'] * scale


def _lab_vec(use_lab, *ps):
    """Pack LearnableAffineBlock scalars for SMEM ([s1, b1, (s2, b2)])."""
    if use_lab:
        return jnp.concatenate(
            [jnp.concatenate([p['lab_scale'], p['lab_bias']]) for p in ps]
        ).astype(jnp.float32)
    return jnp.zeros((2 * len(ps),), jnp.float32)


# ---------------------------------------------------------------------------
# GEMM kernels: im2col-GEMM + bias + ReLU + LAB  (single-K-block, no scratch).
# The "2" variant fuses a second 1x1 ConvBNAct (stem4) into the epilogue.
# ---------------------------------------------------------------------------
def _gemm_act_kernel(lab_ref, a_ref, w_ref, b_ref, o_ref, *, use_lab):
    y = jnp.dot(a_ref[...], w_ref[...], preferred_element_type=jnp.float32)
    y = jnp.maximum(y + b_ref[...], 0.0)
    if use_lab:
        y = lab_ref[0] * y + lab_ref[1]
    o_ref[...] = y.astype(o_ref.dtype)


def _gemm_act2_kernel(lab_ref, a_ref, w1_ref, b1_ref, w2_ref, b2_ref, o_ref, *,
                      use_lab):
    y = jnp.dot(a_ref[...], w1_ref[...], preferred_element_type=jnp.float32)
    y = jnp.maximum(y + b1_ref[...], 0.0)
    if use_lab:
        y = lab_ref[0] * y + lab_ref[1]
    # Fused stem4 (1x1 conv): second dot on the resident tile, single store.
    y = jnp.dot(y.astype(jnp.bfloat16), w2_ref[...],
                preferred_element_type=jnp.float32)
    y = jnp.maximum(y + b2_ref[...], 0.0)
    if use_lab:
        y = lab_ref[2] * y + lab_ref[3]
    o_ref[...] = y.astype(o_ref.dtype)


def _im2col(x, k, stride, pad):
    """x: (N,H,W,C) NHWC -> patches (N*OH*OW, k*k*C) (same dtype), plus OH,OW."""
    n, h, w, c = x.shape
    xp = jnp.pad(x, ((0, 0), pad, pad, (0, 0)))
    hp, wp = h + pad[0] + pad[1], w + pad[0] + pad[1]
    oh = (hp - k) // stride + 1
    ow = (wp - k) // stride + 1
    taps = [xp[:, i:i + stride * (oh - 1) + 1:stride,
               j:j + stride * (ow - 1) + 1:stride, :]
            for i in range(k) for j in range(k)]
    patches = jnp.stack(taps, axis=3)                  # (N, OH, OW, k*k, C)
    return patches.reshape(n * oh * ow, k * k * c), oh, ow


def conv_bn_act_gemm(x, p1, *, kernel_size, stride, padding, use_lab,
                     out_dtype, p2=None):
    """ConvBNAct (+ optional fused 1x1 ConvBNAct) via one Pallas MXU GEMM.

    x: (N, H, W, Cin) bf16 NHWC.  Returns (N, OH, OW, Cout) in out_dtype.
    """
    n = x.shape[0]
    k = kernel_size
    if padding == 'same':          # torch 'same' for even k: pad (0, k-1) after
        t = k - 1
        pad = (t // 2, t - t // 2)
    else:
        pad = (int(padding), int(padding))

    w1, b1 = _fold_conv_bn(p1)                         # BN scale folded into W
    cin, c1 = w1.shape[2], w1.shape[3]
    w1m = w1.reshape(k * k * cin, c1).astype(jnp.bfloat16)
    b1m = b1.reshape(1, c1).astype(jnp.float32)

    patches, oh, ow = _im2col(x, k, stride, pad)       # (M, k*k*Cin) bf16
    m, kk = patches.shape
    tm = min(1024, _round_up(m, 8))                    # big sublane-dense M tiles
    mp = _round_up(m, tm)
    if mp > m:                                         # tiny tail; fuses with the
        patches = jnp.pad(patches, ((0, mp - m), (0, 0)))  # im2col producer fusion

    if p2 is None:
        lab = _lab_vec(use_lab, p1)
        kern = functools.partial(_gemm_act_kernel, use_lab=use_lab)
        args = (lab, patches, w1m, b1m)
        in_specs = [
            pl.BlockSpec(memory_space=pltpu.SMEM),          # LAB scalars
            pl.BlockSpec((tm, kk), lambda i: (i, 0)),       # patches
            pl.BlockSpec((kk, c1), lambda i: (0, 0)),       # BN-folded weights
            pl.BlockSpec((1, c1), lambda i: (0, 0)),        # bias
        ]
        cout = c1
        flops = 2 * mp * kk * c1
    else:
        w2, b2 = _fold_conv_bn(p2)                     # (1,1,c1,c2) 1x1 conv
        c2 = w2.shape[3]
        w2m = w2.reshape(c1, c2).astype(jnp.bfloat16)
        b2m = b2.reshape(1, c2).astype(jnp.float32)
        lab = _lab_vec(use_lab, p1, p2)
        kern = functools.partial(_gemm_act2_kernel, use_lab=use_lab)
        args = (lab, patches, w1m, b1m, w2m, b2m)
        in_specs = [
            pl.BlockSpec(memory_space=pltpu.SMEM),
            pl.BlockSpec((tm, kk), lambda i: (i, 0)),
            pl.BlockSpec((kk, c1), lambda i: (0, 0)),
            pl.BlockSpec((1, c1), lambda i: (0, 0)),
            pl.BlockSpec((c1, c2), lambda i: (0, 0)),
            pl.BlockSpec((1, c2), lambda i: (0, 0)),
        ]
        cout = c2
        flops = 2 * mp * kk * c1 + 2 * mp * c1 * c2

    bytes_acc = 2 * (mp * kk + kk * c1) + mp * cout * jnp.dtype(out_dtype).itemsize
    out = pl.pallas_call(
        kern,
        out_shape=jax.ShapeDtypeStruct((mp, cout), out_dtype),
        grid=(mp // tm,),
        in_specs=in_specs,
        out_specs=pl.BlockSpec((tm, cout), lambda i: (i, 0)),
        compiler_params=pltpu.CompilerParams(
            dimension_semantics=("parallel",)),
        cost_estimate=pl.CostEstimate(flops=int(flops), transcendentals=0,
                                      bytes_accessed=int(bytes_acc)),
    )(*args)
    return out[:m].reshape(n, oh, ow, cout)


# ---------------------------------------------------------------------------
# Fused stem2a -> stem2b -> 2x2/s1 'same' max-pool -> channel concat kernel.
# Implicit GEMM on a row-flattened zero-padded grid: a shift by (i, j) is a
# flat shift by i*(W+1)+j, so 2x2 stride-1 convs are 4 shifted GEMM taps and
# the pool is 4 shifted maxes of the same resident VMEM block.
# ---------------------------------------------------------------------------
def _stem2_pool_kernel(lab_ref, x_ref, mask_ref, w2a_ref, b2a_ref, w2b_ref,
                       b2b_ref, o_ref, *, p, pa, shifts, use_lab):
    mask_a = mask_ref[...]                   # (Pa,1): 1 inside the valid HxW area
    mask_o = mask_ref[0:p, :]                # (P, 1)

    # stem2a: 2x2 / s1 / 'same' conv as 4 shifted bf16 GEMM taps.
    a = jnp.dot(x_ref[0, 0:pa, :], w2a_ref[0],
                preferred_element_type=jnp.float32)
    for t in range(1, 4):
        s = shifts[t]
        a += jnp.dot(x_ref[0, s:s + pa, :], w2a_ref[t],
                     preferred_element_type=jnp.float32)
    a = jnp.maximum(a + b2a_ref[...], 0.0)
    if use_lab:
        a = lab_ref[0] * a + lab_ref[1]
    a = (a * mask_a).astype(jnp.bfloat16)    # zero the 'same'-pad row/col

    # stem2b: second 2x2 conv, reading the in-register stem2a result.
    b = jnp.dot(a[0:p, :], w2b_ref[0], preferred_element_type=jnp.float32)
    for t in range(1, 4):
        s = shifts[t]
        b += jnp.dot(a[s:s + p, :], w2b_ref[t],
                     preferred_element_type=jnp.float32)
    b = jnp.maximum(b + b2b_ref[...], 0.0)
    if use_lab:
        b = lab_ref[2] * b + lab_ref[3]
    b = b * mask_o

    # 2x2 / s1 / 'same' (zero-padded) max-pool of the stem1 output.
    x1 = x_ref[0, 0:p, :]
    for s in shifts[1:]:
        x1 = jnp.maximum(x1, x_ref[0, s:s + p, :])
    x1 = x1.astype(jnp.float32) * mask_o

    # Fused channel concat [pool | stem2b]: single dense store.
    o_ref[0] = jnp.concatenate([x1, b], axis=-1).astype(o_ref.dtype)


def stem2_pool_concat(x1, p2a, p2b, *, use_lab):
    """Returns (N, H+1, W+1, 2C) bf16: channels [maxpool(x1) | stem2b(stem2a(x1))]
    with a zero pad row/col at bottom/right (doubles as stem3's conv padding)."""
    n, h, w, c = x1.shape
    sw = w + 1                               # row stride of the padded grid
    pp = (h + 1) * sw                        # padded-grid positions (output rows)
    pa = pp + sw + 1                         # rows of the stem2a intermediate
    pf = (h + 4) * sw                        # rows of the (extra-)padded input
    xf = jnp.pad(x1, ((0, 0), (0, 4), (0, 1), (0, 0))).reshape(n, pf, c)

    w2a, b2a = _fold_conv_bn(p2a)
    c2a = w2a.shape[3]
    w2a = w2a.reshape(4, c, c2a).astype(jnp.bfloat16)
    b2a = b2a.reshape(1, c2a).astype(jnp.float32)
    w2b, b2b = _fold_conv_bn(p2b)
    w2b = w2b.reshape(4, c2a, c).astype(jnp.bfloat16)
    b2b = b2b.reshape(1, c).astype(jnp.float32)

    idx = np.arange(pa)
    mask = (((idx % sw) != w) & (idx < h * sw)).astype(np.float32)
    mask = jnp.asarray(mask.reshape(pa, 1))
    lab = _lab_vec(use_lab, p2a, p2b)

    kern = functools.partial(_stem2_pool_kernel, p=pp, pa=pa,
                             shifts=(0, 1, sw, sw + 1), use_lab=use_lab)
    out = pl.pallas_call(
        kern,
        out_shape=jax.ShapeDtypeStruct((n, pp, 2 * c), jnp.bfloat16),
        grid=(n,),
        in_specs=[
            pl.BlockSpec(memory_space=pltpu.SMEM),               # LAB scalars
            pl.BlockSpec((1, pf, c), lambda i: (i, 0, 0)),       # stem1 out (flat)
            pl.BlockSpec((pa, 1), lambda i: (0, 0)),             # validity mask
            pl.BlockSpec((4, c, c2a), lambda i: (0, 0, 0)),      # stem2a taps
            pl.BlockSpec((1, c2a), lambda i: (0, 0)),
            pl.BlockSpec((4, c2a, c), lambda i: (0, 0, 0)),      # stem2b taps
            pl.BlockSpec((1, c), lambda i: (0, 0)),
        ],
        out_specs=pl.BlockSpec((1, pp, 2 * c), lambda i: (i, 0, 0)),
        compiler_params=pltpu.CompilerParams(
            dimension_semantics=("parallel",)),
    )(lab, xf, mask, w2a, b2a, w2b, b2b)
    # TODO(synk): for very large post-stem1 feature maps, tile the flattened
    # row axis (with a W+2 halo) so per-step VMEM stays inside v5e/v7x scoped
    # limits and both v7x TensorCores get >=2 parallel grid points.
    return out.reshape(n, h + 1, w + 1, 2 * c)


# ---------------------------------------------------------------------------
# StemBlock forward
# ---------------------------------------------------------------------------
def stem_block(x_nchw, params, *, use_lab=False, text_rec=False):
    x = jnp.transpose(x_nchw, (0, 2, 3, 1)).astype(jnp.bfloat16)   # NHWC bf16
    # stem1: 3x3 / stride 2 / pad 1.
    x = conv_bn_act_gemm(x, params['stem1'], kernel_size=3, stride=2, padding=1,
                         use_lab=use_lab, out_dtype=jnp.bfloat16)
    # stem2a + stem2b + max-pool + concat in one fused kernel.
    x = stem2_pool_concat(x, params['stem2a'], params['stem2b'],
                          use_lab=use_lab)
    # The fused kernel's zero row/col already provide stem3's bottom/right conv
    # padding; add the top/left pad and run stem3 with stem4 fused in.
    x = jnp.pad(x, ((0, 0), (1, 0), (1, 0), (0, 0)))
    x = conv_bn_act_gemm(x, params['stem3'], kernel_size=3,
                         stride=1 if text_rec else 2, padding=0,
                         use_lab=use_lab, out_dtype=jnp.float32,
                         p2=params['stem4'])
    return jnp.transpose(x, (0, 3, 1, 2))                           # NCHW f32
    # TODO(synk): BatchNorm is inference-mode only (running stats folded);
    # training-mode batch statistics are not computed in-kernel.


# ---------------------------------------------------------------------------
# Pure-JAX reference (XLA convs, same bf16-operand / f32-accumulate policy)
# ---------------------------------------------------------------------------
def _ref_conv_bn_act(x, p, *, kernel_size, stride, padding, use_lab):
    k = kernel_size
    if padding == 'same':
        t = k - 1
        pad = ((t // 2, t - t // 2),) * 2
    else:
        pad = ((padding, padding), (padding, padding))
    w, b = _fold_conv_bn(p)
    y = jax.lax.conv_general_dilated(
        x.astype(jnp.bfloat16), w.astype(jnp.bfloat16),
        window_strides=(stride, stride), padding=pad,
        dimension_numbers=('NHWC', 'HWIO', 'NHWC'),
        preferred_element_type=jnp.float32)
    y = jnp.maximum(y + b, 0.0)
    if use_lab:
        y = p['lab_scale'][0] * y + p['lab_bias'][0]
    return y


def _ref_maxpool(x):
    h, w = x.shape[1], x.shape[2]
    xp = jnp.pad(x, ((0, 0), (0, 1), (0, 1), (0, 0)))
    return jnp.maximum(
        jnp.maximum(xp[:, :h, :w], xp[:, :h, 1:w + 1]),
        jnp.maximum(xp[:, 1:h + 1, :w], xp[:, 1:h + 1, 1:w + 1]))


def _ref_stem_block(x_nchw, params, *, use_lab=False, text_rec=False):
    bf = jnp.bfloat16
    x = jnp.transpose(x_nchw, (0, 2, 3, 1)).astype(bf)
    y1 = _ref_conv_bn_act(x, params['stem1'], kernel_size=3, stride=2,
                          padding=1, use_lab=use_lab).astype(bf)
    y2 = _ref_conv_bn_act(y1, params['stem2a'], kernel_size=2, stride=1,
                          padding='same', use_lab=use_lab).astype(bf)
    y2 = _ref_conv_bn_act(y2, params['stem2b'], kernel_size=2, stride=1,
                          padding='same', use_lab=use_lab).astype(bf)
    xc = jnp.concatenate([_ref_maxpool(y1), y2], axis=-1)
    y3 = _ref_conv_bn_act(xc, params['stem3'], kernel_size=3,
                          stride=1 if text_rec else 2, padding=1,
                          use_lab=use_lab).astype(bf)
    y4 = _ref_conv_bn_act(y3, params['stem4'], kernel_size=1, stride=1,
                          padding=0, use_lab=use_lab)
    return jnp.transpose(y4, (0, 3, 1, 2)).astype(jnp.float32)


# ---------------------------------------------------------------------------
# Demo / correctness check
# ---------------------------------------------------------------------------
def _make_conv_bn_act_params(key, c_in, c_out, k, use_lab):
    kw, kg, kb, km, kv = jax.random.split(key, 5)
    fan_in = k * k * c_in
    p = {
        'w': jax.random.normal(kw, (k, k, c_in, c_out), jnp.float32)
             / jnp.sqrt(float(fan_in)),
        'gamma': 1.0 + 0.2 * jax.random.normal(kg, (c_out,), jnp.float32),
        'beta': 0.1 * jax.random.normal(kb, (c_out,), jnp.float32),
        'mean': 0.1 * jax.random.normal(km, (c_out,), jnp.float32),
        'var': 1.0 + 0.5 * jax.random.uniform(kv, (c_out,), jnp.float32),
    }
    if use_lab:
        p['lab_scale'] = jnp.array([1.1], jnp.float32)
        p['lab_bias'] = jnp.array([-0.05], jnp.float32)
    return p


def _run_case(key, *, n, c_in, h, w, mid, c_out, use_lab, text_rec):
    k_x, k_p = jax.random.split(key)
    x = jax.random.normal(k_x, (n, c_in, h, w), jnp.float32)
    ks = jax.random.split(k_p, 5)
    params = {
        'stem1': _make_conv_bn_act_params(ks[0], c_in, mid, 3, use_lab),
        'stem2a': _make_conv_bn_act_params(ks[1], mid, mid // 2, 2, use_lab),
        'stem2b': _make_conv_bn_act_params(ks[2], mid // 2, mid, 2, use_lab),
        'stem3': _make_conv_bn_act_params(ks[3], 2 * mid, mid, 3, use_lab),
        'stem4': _make_conv_bn_act_params(ks[4], mid, c_out, 1, use_lab),
    }
    stem = jax.jit(functools.partial(stem_block, use_lab=use_lab,
                                     text_rec=text_rec))
    y = jax.block_until_ready(stem(x, params))
    y_ref = jax.block_until_ready(
        _ref_stem_block(x, params, use_lab=use_lab, text_rec=text_rec))
    assert y.shape == y_ref.shape, (y.shape, y_ref.shape)
    assert y.dtype == x.dtype
    max_err = float(jnp.max(jnp.abs(y - y_ref)))
    # Both paths use bf16 operands with f32 accumulation; residual error is
    # accumulation-order + bf16-rounding noise.  Real bugs give O(1) errors.
    assert jnp.allclose(y, y_ref, atol=3e-2, rtol=3e-2), max_err
    return y


if __name__ == "__main__":
    key = jax.random.PRNGKey(0)
    k1, k2 = jax.random.split(key)

    # Primary case: NCHW input (2, 4, 16, 16), mid=8, out=16, use_lab=True.
    y = _run_case(k1, n=2, c_in=4, h=16, w=16, mid=8, c_out=16,
                  use_lab=True, text_rec=False)
    assert y.shape == (2, 16, 4, 4)

    # Odd spatial size + text_rec (stride-1 stem3) + no-LAB path, to exercise
    # the M-tail padding and the non-multiple-of-8 flattened-grid width.
    y2 = _run_case(k2, n=1, c_in=3, h=14, w=14, mid=8, c_out=8,
                   use_lab=False, text_rec=True)
    assert y2.shape == (1, 8, 7, 7)

    print("KERNEL_OK")
</pallas_src>

<mosaic_0001>
module attributes {stable_mosaic.version = 11 : i64} {
  func.func @_gemm_act_kernel(%arg0: i32, %arg1: memref<2xf32, #tpu.memory_space<smem>>, %arg2: memref<128x36xbf16, #tpu.memory_space<vmem>>, %arg3: memref<36x8xbf16, #tpu.memory_space<vmem>>, %arg4: memref<1x8xf32, #tpu.memory_space<vmem>>, %arg5: memref<128x8xbf16, #tpu.memory_space<vmem>>) attributes {dimension_semantics = [#tpu.dimension_semantics<parallel>], iteration_bounds = array<i64: 1>, scalar_prefetch = 0 : i64, scratch_operands = 0 : i64, tpu.core_type = #tpu.core_type<tc>, window_params = [{transform_indices = @transform_0, window_bounds = array<i64: 2>}, {transform_indices = @transform_1, window_bounds = array<i64: 128, 36>}, {pipeline_mode = #tpu.pipeline_mode<synchronous>, transform_indices = @transform_2, window_bounds = array<i64: 36, 8>}, {pipeline_mode = #tpu.pipeline_mode<synchronous>, transform_indices = @transform_3, window_bounds = array<i64: 1, 8>}, {transform_indices = @transform_4, window_bounds = array<i64: 128, 8>}]} {
    %c0 = arith.constant 0 : index
    %c0_0 = arith.constant 0 : index
    %0 = vector.load %arg2[%c0, %c0_0] : memref<128x36xbf16, #tpu.memory_space<vmem>>, vector<128x36xbf16>
    %c0_1 = arith.constant 0 : index
    %c0_2 = arith.constant 0 : index
    %1 = vector.load %arg3[%c0_1, %c0_2] : memref<36x8xbf16, #tpu.memory_space<vmem>>, vector<36x8xbf16>
    %cst = arith.constant dense<0.000000e+00> : vector<128x8xf32>
    %2 = tpu.matmul %0, %1, %cst {dimension_numbers = #tpu.dot_dimension_numbers<[1], [0], [0], [1], [0, 0, 1, 1], [], []>} : vector<128x36xbf16>, vector<36x8xbf16>, vector<128x8xf32> -> vector<128x8xf32>
    %c0_3 = arith.constant 0 : index
    %c0_4 = arith.constant 0 : index
    %3 = vector.load %arg4[%c0_3, %c0_4] : memref<1x8xf32, #tpu.memory_space<vmem>>, vector<1x8xf32>
    %4 = vector.broadcast %3 : vector<1x8xf32> to vector<128x8xf32>
    %5 = arith.addf %2, %4 : vector<128x8xf32>
    %cst_5 = arith.constant 0.000000e+00 : f32
    %6 = vector.broadcast %cst_5 : f32 to vector<128x8xf32>
    %7 = arith.maximumf %5, %6 : vector<128x8xf32>
    %c0_6 = arith.constant 0 : index
    %8 = memref.load %arg1[%c0_6] : memref<2xf32, #tpu.memory_space<smem>>
    %9 = vector.broadcast %8 : f32 to vector<128x8xf32>
    %10 = arith.mulf %9, %7 : vector<128x8xf32>
    %c1 = arith.constant 1 : index
    %11 = memref.load %arg1[%c1] : memref<2xf32, #tpu.memory_space<smem>>
    %12 = vector.broadcast %11 : f32 to vector<128x8xf32>
    %13 = arith.addf %10, %12 : vector<128x8xf32>
    %14 = arith.truncf %13 : vector<128x8xf32> to vector<128x8xbf16>
    %c0_7 = arith.constant 0 : index
    %c0_8 = arith.constant 0 : index
    %15 = vector.load %arg5[%c0_7, %c0_8] : memref<128x8xbf16, #tpu.memory_space<vmem>>, vector<128x8xbf16>
    tpu.vector_store %arg5[%c0_7, %c0_8], %14 {strides = array<i32>} : memref<128x8xbf16, #tpu.memory_space<vmem>>, vector<128x8xbf16>,
    return
  }
  func.func @transform_0(%arg0: i32) -> i32 {
    %c0_i32 = arith.constant 0 : i32
    %c0_i32_0 = arith.constant 0 : i32
    return %c0_i32 : i32
  }
  func.func @transform_1(%arg0: i32) -> (i32, i32) {
    %c0_i32 = arith.constant 0 : i32
    %c0_i32_0 = arith.constant 0 : i32
    return %arg0, %c0_i32 : i32, i32
  }
  func.func @transform_2(%arg0: i32) -> (i32, i32) {
    %c0_i32 = arith.constant 0 : i32
    %c0_i32_0 = arith.constant 0 : i32
    %c0_i32_1 = arith.constant 0 : i32
    return %c0_i32, %c0_i32_0 : i32, i32
  }
  func.func @transform_3(%arg0: i32) -> (i32, i32) {
    %c0_i32 = arith.constant 0 : i32
    %c0_i32_0 = arith.constant 0 : i32
    %c0_i32_1 = arith.constant 0 : i32
    return %c0_i32, %c0_i32_0 : i32, i32
  }
  func.func @transform_4(%arg0: i32) -> (i32, i32) {
    %c0_i32 = arith.constant 0 : i32
    %c0_i32_0 = arith.constant 0 : i32
    return %arg0, %c0_i32 : i32, i32
  }
}

module attributes {stable_mosaic.version = 11 : i64} {
  func.func @_stem2_pool_kernel(%arg0: i32, %arg1: memref<4xf32, #tpu.memory_space<smem>>, %arg2: memref<1x108x8xbf16, #tpu.memory_space<vmem>>, %arg3: memref<91x1xf32, #tpu.memory_space<vmem>>, %arg4: memref<4x8x4xbf16, #tpu.memory_space<vmem>>, %arg5: memref<1x4xf32, #tpu.memory_space<vmem>>, %arg6: memref<4x4x8xbf16, #tpu.memory_space<vmem>>, %arg7: memref<1x8xf32, #tpu.memory_space<vmem>>, %arg8: memref<1x81x16xbf16, #tpu.memory_space<vmem>>) attributes {dimension_semantics = [#tpu.dimension_semantics<parallel>], iteration_bounds = array<i64: 2>, scalar_prefetch = 0 : i64, scratch_operands = 0 : i64, tpu.core_type = #tpu.core_type<tc>, window_params = [{transform_indices = @transform_0, window_bounds = array<i64: 4>}, {transform_indices = @transform_1, window_bounds = array<i64: 1, 108, 8>}, {pipeline_mode = #tpu.pipeline_mode<synchronous>, transform_indices = @transform_2, window_bounds = array<i64: 91, 1>}, {pipeline_mode = #tpu.pipeline_mode<synchronous>, transform_indices = @transform_3, window_bounds = array<i64: 4, 8, 4>}, {pipeline_mode = #tpu.pipeline_mode<synchronous>, transform_indices = @transform_4, window_bounds = array<i64: 1, 4>}, {pipeline_mode = #tpu.pipeline_mode<synchronous>, transform_indices = @transform_5, window_bounds = array<i64: 4, 4, 8>}, {pipeline_mode = #tpu.pipeline_mode<synchronous>, transform_indices = @transform_6, window_bounds = array<i64: 1, 8>}, {transform_indices = @transform_7, window_bounds = array<i64: 1, 81, 16>}]} {
    %c0 = arith.constant 0 : index
    %c0_0 = arith.constant 0 : index
    %0 = vector.load %arg3[%c0, %c0_0] : memref<91x1xf32, #tpu.memory_space<vmem>>, vector<91x1xf32>
    %c0_1 = arith.constant 0 : index
    %c0_2 = arith.constant 0 : index
    %1 = vector.load %arg3[%c0_1, %c0_2] : memref<91x1xf32, #tpu.memory_space<vmem>>, vector<81x1xf32>
    %c0_3 = arith.constant 0 : index
    %c0_4 = arith.constant 0 : index
    %c0_5 = arith.constant 0 : index
    %2 = vector.load %arg2[%c0_3, %c0_4, %c0_5] : memref<1x108x8xbf16, #tpu.memory_space<vmem>>, vector<1x91x8xbf16>
    %3 = vector.shape_cast %2 : vector<1x91x8xbf16> to vector<91x8xbf16>
    %c0_6 = arith.constant 0 : index
    %c0_7 = arith.constant 0 : index
    %c0_8 = arith.constant 0 : index
    %4 = vector.load %arg4[%c0_6, %c0_7, %c0_8] : memref<4x8x4xbf16, #tpu.memory_space<vmem>>, vector<1x8x4xbf16>
    %5 = vector.shape_cast %4 : vector<1x8x4xbf16> to vector<8x4xbf16>
    %cst = arith.constant dense<0.000000e+00> : vector<91x4xf32>
    %6 = tpu.matmul %3, %5, %cst {dimension_numbers = #tpu.dot_dimension_numbers<[1], [0], [0], [1], [0, 0, 1, 1], [], []>} : vector<91x8xbf16>, vector<8x4xbf16>, vector<91x4xf32> -> vector<91x4xf32>
    %c0_9 = arith.constant 0 : index
    %c1 = arith.constant 1 : index
    %c0_10 = arith.constant 0 : index
    %7 = vector.load %arg2[%c0_9, %c1, %c0_10] : memref<1x108x8xbf16, #tpu.memory_space<vmem>>, vector<1x91x8xbf16>
    %8 = vector.shape_cast %7 : vector<1x91x8xbf16> to vector<91x8xbf16>
    %c1_11 = arith.constant 1 : index
    %c0_12 = arith.constant 0 : index
    %c0_13 = arith.constant 0 : index
    %9 = vector.load %arg4[%c1_11, %c0_12, %c0_13] : memref<4x8x4xbf16, #tpu.memory_space<vmem>>, vector<1x8x4xbf16>
    %10 = vector.shape_cast %9 : vector<1x8x4xbf16> to vector<8x4xbf16>
    %cst_14 = arith.constant dense<0.000000e+00> : vector<91x4xf32>
    %11 = tpu.matmul %8, %10, %cst_14 {dimension_numbers = #tpu.dot_dimension_numbers<[1], [0], [0], [1], [0, 0, 1, 1], [], []>} : vector<91x8xbf16>, vector<8x4xbf16>, vector<91x4xf32> -> vector<91x4xf32>
    %12 = arith.addf %6, %11 : vector<91x4xf32>
    %c0_15 = arith.constant 0 : index
    %c9 = arith.constant 9 : index
    %c0_16 = arith.constant 0 : index
    %13 = vector.load %arg2[%c0_15, %c9, %c0_16] : memref<1x108x8xbf16, #tpu.memory_space<vmem>>, vector<1x91x8xbf16>
    %14 = vector.shape_cast %13 : vector<1x91x8xbf16> to vector<91x8xbf16>
    %c2 = arith.constant 2 : index
    %c0_17 = arith.constant 0 : index
    %c0_18 = arith.constant 0 : index
    %15 = vector.load %arg4[%c2, %c0_17, %c0_18] : memref<4x8x4xbf16, #tpu.memory_space<vmem>>, vector<1x8x4xbf16>
    %16 = vector.shape_cast %15 : vector<1x8x4xbf16> to vector<8x4xbf16>
    %cst_19 = arith.constant dense<0.000000e+00> : vector<91x4xf32>
    %17 = tpu.matmul %14, %16, %cst_19 {dimension_numbers = #tpu.dot_dimension_numbers<[1], [0], [0], [1], [0, 0, 1, 1], [], []>} : vector<91x8xbf16>, vector<8x4xbf16>, vector<91x4xf32> -> vector<91x4xf32>
    %18 = arith.addf %12, %17 : vector<91x4xf32>
    %c0_20 = arith.constant 0 : index
    %c10 = arith.constant 10 : index
    %c0_21 = arith.constant 0 : index
    %19 = vector.load %arg2[%c0_20, %c10, %c0_21] : memref<1x108x8xbf16, #tpu.memory_space<vmem>>, vector<1x91x8xbf16>
    %20 = vector.shape_cast %19 : vector<1x91x8xbf16> to vector<91x8xbf16>
    %c3 = arith.constant 3 : index
    %c0_22 = arith.constant 0 : index
    %c0_23 = arith.constant 0 : index
    %21 = vector.load %arg4[%c3, %c0_22, %c0_23] : memref<4x8x4xbf16, #tpu.memory_space<vmem>>, vector<1x8x4xbf16>
    %22 = vector.shape_cast %21 : vector<1x8x4xbf16> to vector<8x4xbf16>
    %cst_24 = arith.constant dense<0.000000e+00> : vector<91x4xf32>
    %23 = tpu.matmul %20, %22, %cst_24 {dimension_numbers = #tpu.dot_dimension_numbers<[1], [0], [0], [1], [0, 0, 1, 1], [], []>} : vector<91x8xbf16>, vector<8x4xbf16>, vector<91x4xf32> -> vector<91x4xf32>
    %24 = arith.addf %18, %23 : vector<91x4xf32>
    %c0_25 = arith.constant 0 : index
    %c0_26 = arith.constant 0 : index
    %25 = vector.load %arg5[%c0_25, %c0_26] : memref<1x4xf32, #tpu.memory_space<vmem>>, vector<1x4xf32>
    %26 = vector.broadcast %25 : vector<1x4xf32> to vector<91x4xf32>
    %27 = arith.addf %24, %26 : vector<91x4xf32>
    %cst_27 = arith.constant 0.000000e+00 : f32
    %28 = vector.broadcast %cst_27 : f32 to vector<91x4xf32>
    %29 = arith.maximumf %27, %28 : vector<91x4xf32>
    %c0_28 = arith.constant 0 : index
    %30 = memref.load %arg1[%c0_28] : memref<4xf32, #tpu.memory_space<smem>>
    %31 = vector.broadcast %30 : f32 to vector<91x4xf32>
    %32 = arith.mulf %31, %29 : vector<91x4xf32>
    %c1_29 = arith.constant 1 : index
    %33 = memref.load %arg1[%c1_29] : memref<4xf32, #tpu.memory_space<smem>>
    %34 = vector.broadcast %33 : f32 to vector<91x4xf32>
    %35 = arith.addf %32, %34 : vector<91x4xf32>
    %36 = vector.broadcast %0 : vector<91x1xf32> to vector<91x4xf32>
    %37 = arith.mulf %35, %36 : vector<91x4xf32>
    %38 = arith.truncf %37 : vector<91x4xf32> to vector<91x4xbf16>
    %39 = vector.extract_strided_slice %38 {offsets = [0, 0], sizes = [81, 4], strides = [1, 1]} : vector<91x4xbf16> to vector<81x4xbf16>
    %c0_30 = arith.constant 0 : index
    %c0_31 = arith.constant 0 : index
    %c0_32 = arith.constant 0 : index
    %40 = vector.load %arg6[%c0_30, %c0_31, %c0_32] : memref<4x4x8xbf16, #tpu.memory_space<vmem>>, vector<1x4x8xbf16>
    %41 = vector.shape_cast %40 : vector<1x4x8xbf16> to vector<4x8xbf16>
    %cst_33 = arith.constant dense<0.000000e+00> : vector<81x8xf32>
    %42 = tpu.matmul %39, %41, %cst_33 {dimension_numbers = #tpu.dot_dimension_numbers<[1], [0], [0], [1], [0, 0, 1, 1], [], []>} : vector<81x4xbf16>, vector<4x8xbf16>, vector<81x8xf32> -> vector<81x8xf32>
    %43 = vector.extract_strided_slice %38 {offsets = [1, 0], sizes = [81, 4], strides = [1, 1]} : vector<91x4xbf16> to vector<81x4xbf16>
    %c1_34 = arith.constant 1 : index
    %c0_35 = arith.constant 0 : index
    %c0_36 = arith.constant 0 : index
    %44 = vector.load %arg6[%c1_34, %c0_35, %c0_36] : memref<4x4x8xbf16, #tpu.memory_space<vmem>>, vector<1x4x8xbf16>
    %45 = vector.shape_cast %44 : vector<1x4x8xbf16> to vector<4x8xbf16>
    %cst_37 = arith.constant dense<0.000000e+00> : vector<81x8xf32>
    %46 = tpu.matmul %43, %45, %cst_37 {dimension_numbers = #tpu.dot_dimension_numbers<[1], [0], [0], [1], [0, 0, 1, 1], [], []>} : vector<81x4xbf16>, vector<4x8xbf16>, vector<81x8xf32> -> vector<81x8xf32>
    %47 = arith.addf %42, %46 : vector<81x8xf32>
    %48 = vector.extract_strided_slice %38 {offsets = [9, 0], sizes = [81, 4], strides = [1, 1]} : vector<91x4xbf16> to vector<81x4xbf16>
    %c2_38 = arith.constant 2 : index
    %c0_39 = arith.constant 0 : index
    %c0_40 = arith.constant 0 : index
    %49 = vector.load %arg6[%c2_38, %c0_39, %c0_40] : memref<4x4x8xbf16, #tpu.memory_space<vmem>>, vector<1x4x8xbf16>
    %50 = vector.shape_cast %49 : vector<1x4x8xbf16> to vector<4x8xbf16>
    %cst_41 = arith.constant dense<0.000000e+00> : vector<81x8xf32>
    %51 = tpu.matmul %48, %50, %cst_41 {dimension_numbers = #tpu.dot_dimension_numbers<[1], [0], [0], [1], [0, 0, 1, 1], [], []>} : vector<81x4xbf16>, vector<4x8xbf16>, vector<81x8xf32> -> vector<81x8xf32>
    %52 = arith.addf %47, %51 : vector<81x8xf32>
    %53 = vector.extract_strided_slice %38 {offsets = [10, 0], sizes = [81, 4], strides = [1, 1]} : vector<91x4xbf16> to vector<81x4xbf16>
    %c3_42 = arith.constant 3 : index
    %c0_43 = arith.constant 0 : index
    %c0_44 = arith.constant 0 : index
    %54 = vector.load %arg6[%c3_42, %c0_43, %c0_44] : memref<4x4x8xbf16, #tpu.memory_space<vmem>>, vector<1x4x8xbf16>
    %55 = vector.shape_cast %54 : vector<1x4x8xbf16> to vector<4x8xbf16>
    %cst_45 = arith.constant dense<0.000000e+00> : vector<81x8xf32>
    %56 = tpu.matmul %53, %55, %cst_45 {dimension_numbers = #tpu.dot_dimension_numbers<[1], [0], [0], [1], [0, 0, 1, 1], [], []>} : vector<81x4xbf16>, vector<4x8xbf16>, vector<81x8xf32> -> vector<81x8xf32>
    %57 = arith.addf %52, %56 : vector<81x8xf32>
    %c0_46 = arith.constant 0 : index
    %c0_47 = arith.constant 0 : index
    %58 = vector.load %arg7[%c0_46, %c0_47] : memref<1x8xf32, #tpu.memory_space<vmem>>, vector<1x8xf32>
    %59 = vector.broadcast %58 : vector<1x8xf32> to vector<81x8xf32>
    %60 = arith.addf %57, %59 : vector<81x8xf32>
    %cst_48 = arith.constant 0.000000e+00 : f32
    %61 = vector.broadcast %cst_48 : f32 to vector<81x8xf32>
    %62 = arith.maximumf %60, %61 : vector<81x8xf32>
    %c2_49 = arith.constant 2 : index
    %63 = memref.load %arg1[%c2_49] : memref<4xf32, #tpu.memory_space<smem>>
    %64 = vector.broadcast %63 : f32 to vector<81x8xf32>
    %65 = arith.mulf %64, %62 : vector<81x8xf32>
    %c3_50 = arith.constant 3 : index
    %66 = memref.load %arg1[%c3_50] : memref<4xf32, #tpu.memory_space<smem>>
    %67 = vector.broadcast %66 : f32 to vector<81x8xf32>
    %68 = arith.addf %65, %67 : vector<81x8xf32>
    %69 = vector.broadcast %1 : vector<81x1xf32> to vector<81x8xf32>
    %70 = arith.mulf %68, %69 : vector<81x8xf32>
    %c0_51 = arith.constant 0 : index
    %c0_52 = arith.constant 0 : index
    %c0_53 = arith.constant 0 : index
    %71 = vector.load %arg2[%c0_51, %c0_52, %c0_53] : memref<1x108x8xbf16, #tpu.memory_space<vmem>>, vector<1x81x8xbf16>
    %72 = vector.shape_cast %71 : vector<1x81x8xbf16> to vector<81x8xbf16>
    %c0_54 = arith.constant 0 : index
    %c1_55 = arith.constant 1 : index
    %c0_56 = arith.constant 0 : index
    %73 = vector.load %arg2[%c0_54, %c1_55, %c0_56] : memref<1x108x8xbf16, #tpu.memory_space<vmem>>, vector<1x81x8xbf16>
    %74 = vector.shape_cast %73 : vector<1x81x8xbf16> to vector<81x8xbf16>
    %75 = arith.maximumf %72, %74 : vector<81x8xbf16>
    %c0_57 = arith.constant 0 : index
    %c9_58 = arith.constant 9 : index
    %c0_59 = arith.constant 0 : index
    %76 = vector.load %arg2[%c0_57, %c9_58, %c0_59] : memref<1x108x8xbf16, #tpu.memory_space<vmem>>, vector<1x81x8xbf16>
    %77 = vector.shape_cast %76 : vector<1x81x8xbf16> to vector<81x8xbf16>
    %78 = arith.maximumf %75, %77 : vector<81x8xbf16>
    %c0_60 = arith.constant 0 : index
    %c10_61 = arith.constant 10 : index
    %c0_62 = arith.constant 0 : index
    %79 = vector.load %arg2[%c0_60, %c10_61, %c0_62] : memref<1x108x8xbf16, #tpu.memory_space<vmem>>, vector<1x81x8xbf16>
    %80 = vector.shape_cast %79 : vector<1x81x8xbf16> to vector<81x8xbf16>
    %81 = arith.maximumf %78, %80 : vector<81x8xbf16>
    %82 = arith.extf %81 : vector<81x8xbf16> to vector<81x8xf32>
    %83 = vector.broadcast %1 : vector<81x1xf32> to vector<81x8xf32>
    %84 = arith.mulf %82, %83 : vector<81x8xf32>
    %85 = tpu.concatenate %84, %70 in 1 : vector<81x8xf32>, vector<81x8xf32> -> vector<81x16xf32>
    %86 = arith.truncf %85 : vector<81x16xf32> to vector<81x16xbf16>
    %c0_63 = arith.constant 0 : index
    %c0_64 = arith.constant 0 : index
    %c0_65 = arith.constant 0 : index
    %87 = vector.load %arg8[%c0_63, %c0_64, %c0_65] : memref<1x81x16xbf16, #tpu.memory_space<vmem>>, vector<1x81x16xbf16>
    %88 = vector.shape_cast %87 : vector<1x81x16xbf16> to vector<81x16xbf16>
    %89 = vector.shape_cast %86 : vector<81x16xbf16> to vector<1x81x16xbf16>
    tpu.vector_store %arg8[%c0_63, %c0_64, %c0_65], %89 {strides = array<i32>} : memref<1x81x16xbf16, #tpu.memory_space<vmem>>, vector<1x81x16xbf16>,
    return
  }
  func.func @transform_0(%arg0: i32) -> i32 {
    %c0_i32 = arith.constant 0 : i32
    %c0_i32_0 = arith.constant 0 : i32
    return %c0_i32 : i32
  }
  func.func @transform_1(%arg0: i32) -> (i32, i32, i32) {
    %c0_i32 = arith.constant 0 : i32
    %c0_i32_0 = arith.constant 0 : i32
    %c0_i32_1 = arith.constant 0 : i32
    return %arg0, %c0_i32, %c0_i32_0 : i32, i32, i32
  }
  func.func @transform_2(%arg0: i32) -> (i32, i32) {
    %c0_i32 = arith.constant 0 : i32
    %c0_i32_0 = arith.constant 0 : i32
    %c0_i32_1 = arith.constant 0 : i32
    return %c0_i32, %c0_i32_0 : i32, i32
  }
  func.func @transform_3(%arg0: i32) -> (i32, i32, i32) {
    %c0_i32 = arith.constant 0 : i32
    %c0_i32_0 = arith.constant 0 : i32
    %c0_i32_1 = arith.constant 0 : i32
    %c0_i32_2 = arith.constant 0 : i32
    return %c0_i32, %c0_i32_0, %c0_i32_1 : i32, i32, i32
  }
  func.func @transform_4(%arg0: i32) -> (i32, i32) {
    %c0_i32 = arith.constant 0 : i32
    %c0_i32_0 = arith.constant 0 : i32
    %c0_i32_1 = arith.constant 0 : i32
    return %c0_i32, %c0_i32_0 : i32, i32
  }
  func.func @transform_5(%arg0: i32) -> (i32, i32, i32) {
    %c0_i32 = arith.constant 0 : i32
    %c0_i32_0 = arith.constant 0 : i32
    %c0_i32_1 = arith.constant 0 : i32
    %c0_i32_2 = arith.constant 0 : i32
    return %c0_i32, %c0_i32_0, %c0_i32_1 : i32, i32, i32
  }
  func.func @transform_6(%arg0: i32) -> (i32, i32) {
    %c0_i32 = arith.constant 0 : i32
    %c0_i32_0 = arith.constant 0 : i32
    %c0_i32_1 = arith.constant 0 : i32
    return %c0_i32, %c0_i32_0 : i32, i32
  }
  func.func @transform_7(%arg0: i32) -> (i32, i32, i32) {
    %c0_i32 = arith.constant 0 : i32
    %c0_i32_0 = arith.constant 0 : i32
    %c0_i32_1 = arith.constant 0 : i32
    return %arg0, %c0_i32, %c0_i32_0 : i32, i32, i32
  }
}

module attributes {stable_mosaic.version = 11 : i64} {
  func.func @_gemm_act2_kernel(%arg0: i32, %arg1: memref<4xf32, #tpu.memory_space<smem>>, %arg2: memref<32x144xbf16, #tpu.memory_space<vmem>>, %arg3: memref<144x8xbf16, #tpu.memory_space<vmem>>, %arg4: memref<1x8xf32, #tpu.memory_space<vmem>>, %arg5: memref<8x16xbf16, #tpu.memory_space<vmem>>, %arg6: memref<1x16xf32, #tpu.memory_space<vmem>>, %arg7: memref<32x16xf32, #tpu.memory_space<vmem>>) attributes {dimension_semantics = [#tpu.dimension_semantics<parallel>], iteration_bounds = array<i64: 1>, scalar_prefetch = 0 : i64, scratch_operands = 0 : i64, tpu.core_type = #tpu.core_type<tc>, window_params = [{transform_indices = @transform_0, window_bounds = array<i64: 4>}, {transform_indices = @transform_1, window_bounds = array<i64: 32, 144>}, {pipeline_mode = #tpu.pipeline_mode<synchronous>, transform_indices = @transform_2, window_bounds = array<i64: 144, 8>}, {pipeline_mode = #tpu.pipeline_mode<synchronous>, transform_indices = @transform_3, window_bounds = array<i64: 1, 8>}, {pipeline_mode = #tpu.pipeline_mode<synchronous>, transform_indices = @transform_4, window_bounds = array<i64: 8, 16>}, {pipeline_mode = #tpu.pipeline_mode<synchronous>, transform_indices = @transform_5, window_bounds = array<i64: 1, 16>}, {transform_indices = @transform_6, window_bounds = array<i64: 32, 16>}]} {
    %c0 = arith.constant 0 : index
    %c0_0 = arith.constant 0 : index
    %0 = vector.load %arg2[%c0, %c0_0] : memref<32x144xbf16, #tpu.memory_space<vmem>>, vector<32x144xbf16>
    %c0_1 = arith.constant 0 : index
    %c0_2 = arith.constant 0 : index
    %1 = vector.load %arg3[%c0_1, %c0_2] : memref<144x8xbf16, #tpu.memory_space<vmem>>, vector<144x8xbf16>
    %cst = arith.constant dense<0.000000e+00> : vector<32x8xf32>
    %2 = tpu.matmul %0, %1, %cst {dimension_numbers = #tpu.dot_dimension_numbers<[1], [0], [0], [1], [0, 0, 1, 1], [], []>} : vector<32x144xbf16>, vector<144x8xbf16>, vector<32x8xf32> -> vector<32x8xf32>
    %c0_3 = arith.constant 0 : index
    %c0_4 = arith.constant 0 : index
    %3 = vector.load %arg4[%c0_3, %c0_4] : memref<1x8xf32, #tpu.memory_space<vmem>>, vector<1x8xf32>
    %4 = vector.broadcast %3 : vector<1x8xf32> to vector<32x8xf32>
    %5 = arith.addf %2, %4 : vector<32x8xf32>
    %cst_5 = arith.constant 0.000000e+00 : f32
    %6 = vector.broadcast %cst_5 : f32 to vector<32x8xf32>
    %7 = arith.maximumf %5, %6 : vector<32x8xf32>
    %c0_6 = arith.constant 0 : index
    %8 = memref.load %arg1[%c0_6] : memref<4xf32, #tpu.memory_space<smem>>
    %9 = vector.broadcast %8 : f32 to vector<32x8xf32>
    %10 = arith.mulf %9, %7 : vector<32x8xf32>
    %c1 = arith.constant 1 : index
    %11 = memref.load %arg1[%c1] : memref<4xf32, #tpu.memory_space<smem>>
    %12 = vector.broadcast %11 : f32 to vector<32x8xf32>
    %13 = arith.addf %10, %12 : vector<32x8xf32>
    %14 = arith.truncf %13 : vector<32x8xf32> to vector<32x8xbf16>
    %c0_7 = arith.constant 0 : index
    %c0_8 = arith.constant 0 : index
    %15 = vector.load %arg5[%c0_7, %c0_8] : memref<8x16xbf16, #tpu.memory_space<vmem>>, vector<8x16xbf16>
    %cst_9 = arith.constant dense<0.000000e+00> : vector<32x16xf32>
    %16 = tpu.matmul %14, %15, %cst_9 {dimension_numbers = #tpu.dot_dimension_numbers<[1], [0], [0], [1], [0, 0, 1, 1], [], []>} : vector<32x8xbf16>, vector<8x16xbf16>, vector<32x16xf32> -> vector<32x16xf32>
    %c0_10 = arith.constant 0 : index
    %c0_11 = arith.constant 0 : index
    %17 = vector.load %arg6[%c0_10, %c0_11] : memref<1x16xf32, #tpu.memory_space<vmem>>, vector<1x16xf32>
    %18 = vector.broadcast %17 : vector<1x16xf32> to vector<32x16xf32>
    %19 = arith.addf %16, %18 : vector<32x16xf32>
    %cst_12 = arith.constant 0.000000e+00 : f32
    %20 = vector.broadcast %cst_12 : f32 to vector<32x16xf32>
    %21 = arith.maximumf %19, %20 : vector<32x16xf32>
    %c2 = arith.constant 2 : index
    %22 = memref.load %arg1[%c2] : memref<4xf32, #tpu.memory_space<smem>>
    %23 = vector.broadcast %22 : f32 to vector<32x16xf32>
    %24 = arith.mulf %23, %21 : vector<32x16xf32>
    %c3 = arith.constant 3 : index
    %25 = memref.load %arg1[%c3] : memref<4xf32, #tpu.memory_space<smem>>
    %26 = vector.broadcast %25 : f32 to vector<32x16xf32>
    %27 = arith.addf %24, %26 : vector<32x16xf32>
    %c0_13 = arith.constant 0 : index
    %c0_14 = arith.constant 0 : index
    %28 = vector.load %arg7[%c0_13, %c0_14] : memref<32x16xf32, #tpu.memory_space<vmem>>, vector<32x16xf32>
    tpu.vector_store %arg7[%c0_13, %c0_14], %27 {strides = array<i32>} : memref<32x16xf32, #tpu.memory_space<vmem>>, vector<32x16xf32>,
    return
  }
  func.func @transform_0(%arg0: i32) -> i32 {
    %c0_i32 = arith.constant 0 : i32
    %c0_i32_0 = arith.constant 0 : i32
    return %c0_i32 : i32
  }
  func.func @transform_1(%arg0: i32) -> (i32, i32) {
    %c0_i32 = arith.constant 0 : i32
    %c0_i32_0 = arith.constant 0 : i32
    return %arg0, %c0_i32 : i32, i32
  }
  func.func @transform_2(%arg0: i32) -> (i32, i32) {
    %c0_i32 = arith.constant 0 : i32
    %c0_i32_0 = arith.constant 0 : i32
    %c0_i32_1 = arith.constant 0 : i32
    return %c0_i32, %c0_i32_0 : i32, i32
  }
  func.func @transform_3(%arg0: i32) -> (i32, i32) {
    %c0_i32 = arith.constant 0 : i32
    %c0_i32_0 = arith.constant 0 : i32
    %c0_i32_1 = arith.constant 0 : i32
    return %c0_i32, %c0_i32_0 : i32, i32
  }
  func.func @transform_4(%arg0: i32) -> (i32, i32) {
    %c0_i32 = arith.constant 0 : i32
    %c0_i32_0 = arith.constant 0 : i32
    %c0_i32_1 = arith.constant 0 : i32
    return %c0_i32, %c0_i32_0 : i32, i32
  }
  func.func @transform_5(%arg0: i32) -> (i32, i32) {
    %c0_i32 = arith.constant 0 : i32
    %c0_i32_0 = arith.constant 0 : i32
    %c0_i32_1 = arith.constant 0 : i32
    return %c0_i32, %c0_i32_0 : i32, i32
  }
  func.func @transform_6(%arg0: i32) -> (i32, i32) {
    %c0_i32 = arith.constant 0 : i32
    %c0_i32_0 = arith.constant 0 : i32
    return %arg0, %c0_i32 : i32, i32
  }
}

</mosaic_0001>

<bundles_post_ra>
// kernel: stem_block.3
= control target key start
LH: loop header
LB: loop body
LE: loop exit
PB: predicated region body
PF: predicated region fallthrough
CT: control target
= control target key end

     0   :  { %9 = vsyncpa [#allocation3], 0  ;;  %s363_s18 = smov [#allocation2]   ;;  %s554_s0 = inlined_call_operand.vmem [shape: f32[2], index: 0, kind: input, shape index: {}]   ;;  %s555_s1 = inlined_call_operand.vmem [shape: bf16[128,36], index: 1, kind: input, shape index: {}]   ;;  %s556_s2 = inlined_call_operand.vmem [shape: bf16[36,8], index: 2, kind: input, shape index: {}]   ;;  %s557_s3 = inlined_call_operand.vmem [shape: f32[1,8], index: 3, kind: input, shape index: {}]   ;;  %s558_s4 = inlined_call_operand.vmem [shape: bf16[128,8], index: 4, kind: output, shape index: {}]  }
   0x1   :  { %s15_s17 = sshll.u32 %s554_s0, 4  ;;  %s16_s17 = int_to_ptr.vmem [resolvable:$true] %s15_s17 }
   0x2   :  { %18 = dma.vmem_to_smem %s16_s17, 16, %s363_s18, [#allocation3]  }
   0x3   :  { %361 = dma.done.wait [#allocation3], 16  }
   0x4   :  { %362 = vsyncadd [#allocation3], 4294967280 }
   0x5   :  { %29 = sfence }
   0x6   :  { %v51_v0 = vld [vmem:[%s556_s2 + $0x10] sm:$0x3]  ;;  %vm136_vm0 = vcmask 1041408   ;;  %v337_v4 = vld [vmem:[%s556_s2 + $0x8] sm:$0xff]  ;;  %v336_v5 = vld [vmem:[%s556_s2] sm:$0xff]  ;;  %vm111_vm1 = vcmask 293888  }
   0x7   :  { %v105_v1 = vunpack.c.l.b16 %v51_v0  ;;  %v328_v6 = vld [vmem:[%s555_s1] sm:$0xff]  ;;  %v330_v7 = vld [vmem:[%s555_s1 + $0x10] sm:$0xff]  ;;  %v329_v10 = vld [vmem:[%s555_s1 + $0x8] sm:$0xff]  ;;  %s205_s13 = sld [smem:[#allocation2]]  ;;  %vm257_vm2 = vcmask 60416  }
   0x8   :  { %v332_v8 = vld [vmem:[%s555_s1 + $0x20] sm:$0xff]  ;;  %v334_v9 = vld [vmem:[%s555_s1 + $0x30] sm:$0xff]  ;;  %v331_v11 = vld [vmem:[%s555_s1 + $0x18] sm:$0xff]  ;;  %s327_s14 = sld [smem:[#allocation2 + $0x1]] }
   0x9   :  { %v108_v2 = vpack.c.b16 %v105_v1, %v105_v1  ;;  %v333_v12 = vld [vmem:[%s555_s1 + $0x28] sm:$0xff]  ;;  %v335_v13 = vld [vmem:[%s555_s1 + $0x38] sm:$0xff]  ;;  %v436_v14 = vld [vmem:[%s557_s3] ss:$0 sm:$0xff] }
   0xb   :  { %v138_v3 = vsel %vm136_vm0, %v108_v2, 0 }
   0xc   :  { %145 = vmatpush.bf16.msra.mxu0 %v138_v3  ;;  %338 = vmatpush.bf16.msra.mxu1 %v138_v3 }
   0xd   :  { %339 = vmatpush.bf16.msra.mxu2 %v138_v3  ;;  %340 = vmatpush.bf16.msra.mxu3 %v138_v3  ;;  %v440_v19 = vstv %s205_s13 }
   0xe   :  { %v442_v22 = vstv %s327_s14 }
  0x10   :  { %146 = vmatpush.bf16.msra.mxu0 %v337_v4  ;;  %341 = vmatpush.bf16.msra.mxu1 %v337_v4 }
  0x11   :  { %342 = vmatpush.bf16.msra.mxu2 %v337_v4  ;;  %343 = vmatpush.bf16.msra.mxu3 %v337_v4 }
  0x14   :  { %147 = vmatpush.bf16.msra.mxu0 %v336_v5  ;;  %344 = vmatpush.bf16.msra.mxu1 %v336_v5 }
  0x15   :  { %345 = vmatpush.bf16.msra.mxu2 %v336_v5  ;;  %346 = vmatpush.bf16.msra.mxu3 %v336_v5 }
  0x17   :  { %319 = vmatmul.msk.bf16.vlgmr.msra.gmra.mxu0 %vm111_vm1, %v328_v6  ;;  %321 = vmatmul.msk.bf16.vlgmr.msra.gmra.mxu1 %vm111_vm1, %v330_v7 }
  0x18   :  { %323 = vmatmul.msk.bf16.vlgmr.msra.gmra.mxu2 %vm111_vm1, %v332_v8  ;;  %325 = vmatmul.msk.bf16.vlgmr.msra.gmra.mxu3 %vm111_vm1, %v334_v9 }
  0x27   :  { %320 = vmatmul.msk.bf16.gmra.mxu0 %vm111_vm1, %v329_v10  ;;  %322 = vmatmul.msk.bf16.gmra.mxu1 %vm111_vm1, %v331_v11 }
  0x28   :  { %324 = vmatmul.msk.bf16.gmra.mxu2 %vm111_vm1, %v333_v12  ;;  %326 = vmatmul.msk.bf16.gmra.mxu3 %vm111_vm1, %v335_v13 }
  0x94   :  { %v149_v15 = vpop.f32.mrf.mxu0  ;;  %v159_v16 = vpop.f32.mrf.mxu1 }
  0x95   :  { %v150_v17 = vadd.f32 %v436_v14, %v149_v15  ;;  %v160_v18 = vadd.f32 %v436_v14, %v159_v16 }
  0x97   :  { %v189_v20 = vmax.f32 %v150_v17, 0.0  ;;  %v193_v21 = vmax.f32 %v160_v18, 0.0 }
  0x99   :  { %v207_v23 = vmul.f32 %v440_v19, %v189_v20  ;;  %v211_v24 = vmul.f32 %v440_v19, %v193_v21 }
  0x9b   :  { %v225_v25 = vadd.f32 %v442_v22, %v207_v23  ;;  %v229_v26 = vadd.f32 %v442_v22, %v211_v24  ;;  %v169_v27 = vpop.f32.mrf.mxu2  ;;  %v179_v28 = vpop.f32.mrf.mxu3 }
  0x9c   :  { %v170_v29 = vadd.f32 %v436_v14, %v169_v27  ;;  %v180_v30 = vadd.f32 %v436_v14, %v179_v28  ;;  %v151_v31 = vpop.f32.mrf.mxu0  ;;  %v161_v32 = vpop.f32.mrf.mxu1 }
  0x9d   :  { %v241_v33 = vpack.c.bf16 %v225_v25, %v225_v25  ;;  %v245_v34 = vpack.c.bf16 %v229_v26, %v229_v26  ;;  %v152_v35 = vadd.f32 %v436_v14, %v151_v31  ;;  %v162_v36 = vadd.f32 %v436_v14, %v161_v32 }
  0x9e   :  { %v197_v37 = vmax.f32 %v170_v29, 0.0  ;;  %v201_v38 = vmax.f32 %v180_v30, 0.0 }
  0x9f   :  { %258 = vst.msk [vmem:[%s558_s4] sm:$0xf] %vm257_vm2, %v241_v33  ;;  %v190_v39 = vmax.f32 %v152_v35, 0.0  ;;  %v194_v40 = vmax.f32 %v162_v36, 0.0 }
  0xa0   :  { %262 = vst.msk [vmem:[%s558_s4 + $0x10] sm:$0xf] %vm257_vm2, %v245_v34  ;;  %v215_v41 = vmul.f32 %v440_v19, %v197_v37  ;;  %v219_v42 = vmul.f32 %v440_v19, %v201_v38 }
  0xa1   :  { %v208_v43 = vmul.f32 %v440_v19, %v190_v39  ;;  %v212_v44 = vmul.f32 %v440_v19, %v194_v40 }
  0xa2   :  { %v233_v45 = vadd.f32 %v442_v22, %v215_v41  ;;  %v237_v46 = vadd.f32 %v442_v22, %v219_v42 }
  0xa3   :  { %v226_v47 = vadd.f32 %v442_v22, %v208_v43  ;;  %v230_v48 = vadd.f32 %v442_v22, %v212_v44  ;;  %v171_v49 = vpop.f32.mrf.mxu2  ;;  %v181_v50 = vpop.f32.mrf.mxu3 }
  0xa4   :  { %v249_v51 = vpack.c.bf16 %v233_v45, %v233_v45  ;;  %v253_v52 = vpack.c.bf16 %v237_v46, %v237_v46  ;;  %v172_v53 = vadd.f32 %v436_v14, %v171_v49  ;;  %v182_v54 = vadd.f32 %v436_v14, %v181_v50  ;;  %v154_v55 = vpop.f32.mrf.mxu0  ;;  %v164_v56 = vpop.f32.mrf.mxu1 }
  0xa5   :  { %v242_v57 = vpack.c.bf16 %v226_v47, %v226_v47  ;;  %v246_v58 = vpack.c.bf16 %v230_v48, %v230_v48  ;;  %v155_v59 = vadd.f32 %v436_v14, %v154_v55  ;;  %v165_v60 = vadd.f32 %v436_v14, %v164_v56 }
  0xa6   :  { %266 = vst.msk [vmem:[%s558_s4 + $0x20] sm:$0xf] %vm257_vm2, %v249_v51  ;;  %v198_v61 = vmax.f32 %v172_v53, 0.0  ;;  %v202_v62 = vmax.f32 %v182_v54, 0.0 }
  0xa7   :  { %270 = vst.msk [vmem:[%s558_s4 + $0x30] sm:$0xf] %vm257_vm2, %v253_v52  ;;  %v191_v63 = vmax.f32 %v155_v59, 0.0  ;;  %v195_v0 = vmax.f32 %v165_v60, 0.0 }
  0xa8   :  { %259 = vst.msk [vmem:[%s558_s4 + $0x4] sm:$0xf] %vm257_vm2, %v242_v57  ;;  %v216_v1 = vmul.f32 %v440_v19, %v198_v61  ;;  %v220_v2 = vmul.f32 %v440_v19, %v202_v62 }
  0xa9   :  { %263 = vst.msk [vmem:[%s558_s4 + $0x14] sm:$0xf] %vm257_vm2, %v246_v58  ;;  %v209_v3 = vmul.f32 %v440_v19, %v191_v63  ;;  %v213_v4 = vmul.f32 %v440_v19, %v195_v0 }
  0xaa   :  { %v234_v5 = vadd.f32 %v442_v22, %v216_v1  ;;  %v238_v6 = vadd.f32 %v442_v22, %v220_v2 }
  0xab   :  { %v227_v7 = vadd.f32 %v442_v22, %v209_v3  ;;  %v231_v8 = vadd.f32 %v442_v22, %v213_v4  ;;  %v174_v9 = vpop.f32.mrf.mxu2  ;;  %v184_v10 = vpop.f32.mrf.mxu3 }
  0xac   :  { %v250_v11 = vpack.c.bf16 %v234_v5, %v234_v5  ;;  %v254_v12 = vpack.c.bf16 %v238_v6, %v238_v6  ;;  %v175_v13 = vadd.f32 %v436_v14, %v174_v9  ;;  %v185_v15 = vadd.f32 %v436_v14, %v184_v10  ;;  %v156_v16 = vpop.f32.mrf.mxu0  ;;  %v166_v17 = vpop.f32.mrf.mxu1 }
  0xad   :  { %v243_v18 = vpack.c.bf16 %v227_v7, %v227_v7  ;;  %v247_v20 = vpack.c.bf16 %v231_v8, %v231_v8  ;;  %v157_v21 = vadd.f32 %v436_v14, %v156_v16  ;;  %v167_v23 = vadd.f32 %v436_v14, %v166_v17 }
  0xae   :  { %267 = vst.msk [vmem:[%s558_s4 + $0x24] sm:$0xf] %vm257_vm2, %v250_v11  ;;  %v199_v24 = vmax.f32 %v175_v13, 0.0  ;;  %v203_v25 = vmax.f32 %v185_v15, 0.0 }
  0xaf   :  { %271 = vst.msk [vmem:[%s558_s4 + $0x34] sm:$0xf] %vm257_vm2, %v254_v12  ;;  %v192_v26 = vmax.f32 %v157_v21, 0.0  ;;  %v196_v27 = vmax.f32 %v167_v23, 0.0 }
  0xb0   :  { %260 = vst.msk [vmem:[%s558_s4 + $0x8] sm:$0xf] %vm257_vm2, %v243_v18  ;;  %v217_v28 = vmul.f32 %v440_v19, %v199_v24  ;;  %v221_v29 = vmul.f32 %v440_v19, %v203_v25 }
  0xb1   :  { %264 = vst.msk [vmem:[%s558_s4 + $0x18] sm:$0xf] %vm257_vm2, %v247_v20  ;;  %v210_v30 = vmul.f32 %v440_v19, %v192_v26  ;;  %v214_v31 = vmul.f32 %v440_v19, %v196_v27 }
  0xb2   :  { %v235_v32 = vadd.f32 %v442_v22, %v217_v28  ;;  %v239_v33 = vadd.f32 %v442_v22, %v221_v29 }
  0xb3   :  { %v228_v34 = vadd.f32 %v442_v22, %v210_v30  ;;  %v232_v35 = vadd.f32 %v442_v22, %v214_v31  ;;  %v176_v36 = vpop.f32.mrf.mxu2  ;;  %v186_v37 = vpop.f32.mrf.mxu3 }
  0xb4   :  { %v251_v38 = vpack.c.bf16 %v235_v32, %v235_v32  ;;  %v255_v39 = vpack.c.bf16 %v239_v33, %v239_v33  ;;  %v177_v40 = vadd.f32 %v436_v14, %v176_v36  ;;  %v187_v41 = vadd.f32 %v436_v14, %v186_v37 }
  0xb5   :  { %v244_v42 = vpack.c.bf16 %v228_v34, %v228_v34  ;;  %v248_v43 = vpack.c.bf16 %v232_v35, %v232_v35 }
  0xb6   :  { %268 = vst.msk [vmem:[%s558_s4 + $0x28] sm:$0xf] %vm257_vm2, %v251_v38  ;;  %v200_v44 = vmax.f32 %v177_v40, 0.0  ;;  %v204_v45 = vmax.f32 %v187_v41, 0.0 }
  0xb7   :  { %272 = vst.msk [vmem:[%s558_s4 + $0x38] sm:$0xf] %vm257_vm2, %v255_v39 }
  0xb8   :  { %261 = vst.msk [vmem:[%s558_s4 + $0xc] sm:$0xf] %vm257_vm2, %v244_v42  ;;  %v218_v14 = vmul.f32 %v440_v19, %v200_v44  ;;  %v222_v46 = vmul.f32 %v440_v19, %v204_v45 }
  0xb9   :  { %265 = vst.msk [vmem:[%s558_s4 + $0x1c] sm:$0xf] %vm257_vm2, %v248_v43 }
  0xba   :  { %v236_v47 = vadd.f32 %v442_v22, %v218_v14  ;;  %v240_v48 = vadd.f32 %v442_v22, %v222_v46 }
  0xbc   :  { %v252_v49 = vpack.c.bf16 %v236_v47, %v236_v47  ;;  %v256_v50 = vpack.c.bf16 %v240_v48, %v240_v48 }
  0xbe   :  { %269 = vst.msk [vmem:[%s558_s4 + $0x2c] sm:$0xf] %vm257_vm2, %v252_v49 }
  0xbf   :  { %273 = vst.msk [vmem:[%s558_s4 + $0x3c] sm:$0xf] %vm257_vm2, %v256_v50 }
  0xc0   :  { %278 = vsyncpa [#allocation3], 1 }

// kernel: stem_block.4
= control target key start
LH: loop header
LB: loop body
LE: loop exit
PB: predicated region body
PF: predicated region fallthrough
CT: control target
= control target key end

     0   :  { %12 = vsyncpa [#allocation3], 0  ;;  %s2107_s24 = smov 0   ;;  %s2607_s0 = inlined_call_operand.vmem [shape: f32[4], index: 0, kind: input, shape index: {}]   ;;  %s2608_s1 = inlined_call_operand.vmem [shape: bf16[2,108,8], index: 1, kind: input, shape index: {}]   ;;  %s2609_s2 = inlined_call_operand.vmem [shape: f32[91,1], index: 2, kind: input, shape index: {}]   ;;  %s2610_s3 = inlined_call_operand.vmem [shape: bf16[4,8,4], index: 3, kind: input, shape index: {}]   ;;  %s2611_s4 = inlined_call_operand.vmem [shape: f32[1,4], index: 4, kind: input, shape index: {}]   ;;  %s2612_s5 = inlined_call_operand.vmem [shape: bf16[4,4,8], index: 5, kind: input, shape index: {}]   ;;  %s2613_s6 = inlined_call_operand.vmem [shape: f32[1,8], index: 6, kind: input, shape index: {}]   ;;  %s2614_s7 = inlined_call_operand.vmem [shape: bf16[2,81,16], index: 7, kind: output, shape index: {}]  }
   0x1 LB: > { %s2113_s25 = sadd.s32 4294967295, %s2062_s24   ;;  %p1842_p0 = scmp.ge.s32.totalorder %s2062_s24, 1  ;;  %s2062_s24 = sphi %s2107_s24, %s18_s24  }
   0x2   : > { %p201_p1 = scmp.lt.s32.totalorder %s2062_s24, 3  ;;  %s213_s28 = sshll.u32 %s2607_s0, 4  ;;  %s214_s28 = int_to_ptr.vmem [resolvable:$true] %s213_s28 }
   0x3   : > { %p1992_p3 = scmp.eq.s32.totalorder %s2113_s25, 0  ;;  %s2064_s29 = smov [#allocation2]  }
   0x4   : > { %p202_p2 = pnand %p1842_p0, %p201_p1 }
   0x6   : > { %p1988_p4 = pneg %p202_p2  ;;  %249 = sbr.rel (%p202_p2) target bundleno = 562 (0x232), region = 48 }
   0x8   : > { %p1989_p5 = pnand %p1992_p3, %p1988_p4 }
   0xa   : > { %1991 = dma.vmem_to_smem (!%p1989_p5), %s214_s28, 16, %s2064_s29, [#allocation3]  }
   0xb   : > { %2057 = dma.done.wait (%p1992_p3), [#allocation3], 16  }
   0xc   : > { %2059 = vsyncadd (%p1992_p3), [#allocation3], 4294967280 }
   0xd   : > { %256 = sfence }
   0xe   : > { %v319_v0 = vld [vmem:[%s2610_s3] sm:$0xf]  ;;  %vm419_vm0 = vcmask 1043456   ;;  %v1909_v1 = vld [vmem:[%s2610_s3 + $0xc] sm:$0xf]  ;;  %v2065_v4 = vmov 0  }
   0xf   : > { %v475_v2 = vsel %vm419_vm0, %v319_v0, 0  ;;  %v720_v3 = vsel %vm419_vm0, %v1909_v1, 0  ;;  %2005 = vset.pattern.permute.xlu0 %v2065_v4  ;;  %v1849_v5 = vld [vmem:[%s2610_s3 + $0x4] sm:$0xf]  ;;  %v2135_v6 = vld [vmem:[%s2609_s2 + $0x8] sm:$0xff]  ;;  %2006 = vset.pattern.permute.xlu1 %v2065_v4  ;;  %p283_p6 = scmp.lt.s32.totalorder %s2113_s25, 1 }
  0x10   : > { %484 = vmatpush.bf16.msra.mxu1 %v475_v2  ;;  %729 = vmatpush.bf16.msra.mxu3 %v720_v3  ;;  %v421_v7 = vsel %vm419_vm0, %v1849_v5, 0  ;;  %v1886_v8 = vld [vmem:[%s2610_s3 + $0x8] sm:$0xf]  ;;  %v2145_v9 = vld [vmem:[%s2609_s2 + $0x18] sm:$0xff]  ;;  %v2157_v11 = vld [vmem:[%s2609_s2] sm:$0xff]  ;;  %vm400_vm1 = vcmask 64512  }
  0x11   : > { %430 = vmatpush.bf16.msra.mxu0 %v421_v7  ;;  %836 = vperm.xlu0 %2005, %v2135_v6   ;;  %s2616_s25 = smov (!%p283_p6, %s2113_s25), 1  ;;  %v626_v10 = vsel %vm419_vm0, %v1886_v8, 0  ;;  %v2167_v12 = vld [vmem:[%s2609_s2 + $0x10] sm:$0xff]  ;;  %v2172_v13 = vld [vmem:[%s2609_s2 + $0x20] sm:$0xff]  ;;  %vm689_vm2 = vcmask 1046528   ;;  %v2196_v41 = vld [vmem:[%s2609_s2 + $0x38] sm:$0xff] }
  0x12   : > { %635 = vmatpush.bf16.msra.mxu2 %v626_v10  ;;  %846 = vperm.xlu1 %2006, %v2145_v9   ;;  %s1982_s19 = smul.u32 56, %s2616_s25  ;;  %vm352_vm3 = vsmask.f32 7424  ;;  %v2189_v38 = vld [vmem:[%s2609_s2 + $0x30] sm:$0xff]  ;;  %v299_v48 = vld [vmem:[%s2609_s2 + $0x28] sm:$0xff]  ;;  %v302_v1 = vld [vmem:[%s2609_s2 + $0x40] sm:$0xff] }
  0x13   : > { %2007 = vset.pattern.permute.xlu2 %v2065_v4  ;;  %v303_v49 = vld [vmem:[%s2609_s2 + $0x48] sm:$0xff]  ;;  %v304_v50 = vld [vmem:[%s2609_s2 + $0x50] sm:$0xff]  ;;  %vm1009_vm4 = vcmask 1041408   ;;  %s801_s12 = sld [smem:[#allocation2]]  ;;  %vm990_vm5 = vcmask 31744   ;;  %s2066_s20 = smov 8  }
  0x14   : > { %s2162_s26 = scalar_lea.vmem %s2608_s1, %s1982_s19  ;;  %831 = vperm.xlu2 %2007, %v2157_v11   ;;  %v306_v2 = vld [vmem:[%s2609_s2 + $0x50] sm:$0x1]  ;;  %s1916_s15 = sld [smem:[#allocation2 + $0x1]]  ;;  %vm1613_vm6 = vcmask 1045504   ;;  %vm1756_vm7 = vcmask 125952   ;;  %vm1767_vm8 = vcmask 122880  }
  0x15   : > { %v1948_v14 = vld [vmem:[%s2162_s26] sm:$0xff]  ;;  %v517_v15 = vld [vmem:[%s2162_s26 + $0x8] sm:$0xff]   ;;  %v1950_v42 = vld [vmem:[%s2162_s26 + $0x10] sm:$0xff]  ;;  %s1944_s18 = sld [smem:[#allocation2 + $0x2]]  ;;  %s1983_s21 = smul.u32 44, %s2616_s25 }
  0x16   : > { %v1954_v16 = vld [vmem:[%s2162_s26 + $0xc] sm:$0xff]  ;;  %v543_v17 = vunpack.c.l.b16 %v517_v15  ;;  %v679_v18 = vld [vmem:[%s2162_s26 + $0x4] sm:$0xe]  ;;  %v356_v21 = vshll.u32 %v1948_v14, 16  ;;  %1880 = vmatmul.msk.bf16.vlgmr.msra.gmra.mxu1 %vm400_vm1, %v1948_v14  ;;  %v354_v23 = vshrl.u32 %v1948_v14, 16  ;;  %v1955_v45 = vld [vmem:[%s2162_s26 + $0x14] sm:$0xff] }
  0x17   : > { %v1949_v19 = vld [vmem:[%s2162_s26 + $0x8] sm:$0xff]  ;;  %v685_v22 = vunpack.c.l.b16 %v679_v18  ;;  %v691_v27 = vrot.slane %v1954_v16, 1  ;;  %v568_v31 = vshll.u32 %v1954_v16, 16  ;;  %v369_v47 = vshll.u32 %v1950_v42, 16  ;;  %v1951_v60 = vld [vmem:[%s2162_s26 + $0x18] sm:$0xff]  ;;  %s1945_s19 = sld [smem:[#allocation2 + $0x3]]  ;;  %s2515_s23 = scalar_lea.vmem %s2614_s7, %s1983_s21 }
  0x18   : > { %v516_v20 = vld [vmem:[%s2162_s26 + $0x4] sm:$0xff]   ;;  %v361_v24 = vshll.u32 %v1949_v19, 16  ;;  %v358_v28 = vrot.slane %v356_v21, 1  ;;  %v365_v46 = vshrl.u32 %v1949_v19, 16  ;;  %v693_v51 = vrot.slane %v1955_v45, 1  ;;  %v1956_v62 = vld [vmem:[%s2162_s26 + $0x1c] sm:$0xff] }
  0x19   : > { %v542_v25 = vunpack.c.l.b16 %v516_v20  ;;  %841 = vperm.xlu0 %2005, %v2167_v12   ;;  %v687_v26 = vpack.c.b16 %v543_v17, %v685_v22  ;;  %v570_v40 = vrot.slane %v568_v31, 1  ;;  %v371_v53 = vrot.slane %v369_v47, 1  ;;  %v305_v15 = vld [vmem:[%s2609_s2 + $0x58] sm:$0x7]  ;;  %v1872_v31 = vld [vmem:[%s2162_s26 + $0x28] sm:$0xf] }
  0x1a   : > { %851 = vperm.xlu1 %2006, %v2172_v13   ;;  %v363_v29 = vrot.slane %v361_v24, 1  ;;  %v359_v33 = vor.u32 %v358_v28, %v354_v23  ;;  %v572_v54 = vshrl.u32 %v1954_v16, 16  ;;  %v576_v55 = vshll.u32 %v1955_v45, 16  ;;  %v1952_v16 = vld [vmem:[%s2162_s26 + $0x20] sm:$0xff]  ;;  %v526_v28 = vld [vmem:[%s2162_s26 + $0x2c] sm:$0xf] }
  0x1b   : > { %v554_v30 = vpack.c.b16 %v543_v17, %v542_v25  ;;  %v690_v32 = vrot.slane %v687_v26, 1  ;;  %v694_v56 = vsel %vm689_vm2, %v691_v27, %v693_v51  ;;  %v373_v63 = vshrl.u32 %v1950_v42, 16  ;;  %v913_v47 = vld [vmem:[%s2612_s5] sm:$0x3] }
  0x1c   : > { %v364_v37 = vsel %vm352_vm3, %v359_v33, %v363_v29  ;;  %856 = vperm.xlu2 %2007, %v299_v48   ;;  %v367_v52 = vor.u32 %v365_v46, %v363_v29  ;;  %v574_v58 = vor.u32 %v572_v54, %v570_v40  ;;  %v578_v59 = vrot.slane %v576_v55, 1  ;;  %v527_v33 = vld [vmem:[%s2162_s26 + $0x30] sm:$0x3]  ;;  %v1917_v46 = vld [vmem:[%s2612_s5 + $0x2] sm:$0x3] }
  0x1d   : > { %v561_v34 = vshrl.u32 %v554_v30, 16  ;;  %v563_v35 = vshll.u32 %v554_v30, 16  ;;  %v692_v36 = vsel %vm689_vm2, %v690_v32, %v691_v27  ;;  %1874 = vmatmul.msk.bf16.vlgmr.msra.gmra.mxu0 %vm400_vm1, %v364_v37  ;;  %v377_v0 = vshll.u32 %v1951_v60, 16  ;;  %v680_v30 = vld [vmem:[%s2162_s26 + $0x30] sm:$0x7] }
  0x1e   : > { %1910 = vmatmul.msk.bf16.vlgmr.msra.gmra.mxu3 %vm400_vm1, %v692_v36  ;;  %v372_v57 = vsel %vm352_vm3, %v367_v52, %v371_v53  ;;  %v579_v61 = vsel %vm352_vm3, %v574_v58, %v578_v59  ;;  %v695_v3 = vrot.slane %v1956_v62, 1  ;;  %v375_v4 = vor.u32 %v373_v63, %v371_v53  ;;  %v1953_v32 = vld [vmem:[%s2162_s26 + $0x28] sm:$0x30] }
  0x1f   : > { %v565_v39 = vrot.slane %v563_v35, 1  ;;  %v379_v5 = vrot.slane %v377_v0, 1  ;;  %v584_v7 = vshll.u32 %v1956_v62, 16  ;;  %v381_v18 = vshrl.u32 %v1951_v60, 16 }
  0x20   : > { %v696_v8 = vsel %vm689_vm2, %v693_v51, %v695_v3  ;;  %v588_v24 = vshrl.u32 %v1956_v62, 16  ;;  %v1873_v35 = vor.u32 %v1953_v32, %v1872_v31  ;;  %v553_v37 = vunpack.c.l.b16 %v527_v33 }
  0x21   : > { %v566_v43 = vor.u32 %v565_v39, %v561_v34  ;;  %861 = vperm.xlu0 %2005, %v2189_v38   ;;  %v380_v10 = vsel %vm352_vm3, %v375_v4, %v379_v5  ;;  %v586_v14 = vrot.slane %v584_v7, 1  ;;  %v383_v21 = vor.u32 %v381_v18, %v379_v5 }
  0x22   : > { %866 = vperm.xlu1 %2006, %v2196_v41   ;;  %v552_v34 = vunpack.c.l.b16 %v526_v28  ;;  %vm1768_vm9 = vsmask.f32 256 }
  0x23   : > { %v571_v44 = vsel %vm352_vm3, %v566_v43, %v570_v40  ;;  %v590_v29 = vor.u32 %v588_v24, %v586_v14  ;;  %v393_v40 = vshll.u32 %v1873_v35, 16  ;;  %v1937_v43 = vld [vmem:[%s2612_s5 + $0x6] sm:$0x3]  ;;  %vm1769_vm10 = vmand %vm1767_vm8, %vm1768_vm9 }
  0x24   : > { %1903 = vmatmul.msk.bf16.vlgmr.msra.gmra.mxu2 %vm400_vm1, %v571_v44  ;;  %871 = vperm.xlu2 %2007, %v302_v1   ;;  %v559_v44 = vpack.c.b16 %v553_v37, %v552_v34 }
  0x25   : > { %v395_v52 = vrot.slane %v393_v40, 1 }
  0x26   : > { %1881 = vmatmul.msk.bf16.gmra.mxu1 %vm400_vm1, %v1949_v19  ;;  %v385_v19 = vshll.u32 %v1952_v16, 16  ;;  %v600_v54 = vshll.u32 %v559_v44, 16 }
  0x28   : > { %v387_v22 = vrot.slane %v385_v19, 1  ;;  %v602_v58 = vrot.slane %v600_v54, 1 }
  0x29   : > { %876 = vperm.xlu0 %2005, %v303_v49  }
  0x2a   : > { %881 = vperm.xlu1 %2006, %v304_v50   ;;  %v388_v26 = vsel %vm352_vm3, %v383_v21, %v387_v22 }
  0x2c   : > { %886 = vperm.xlu2 %2007, %v305_v15  }
  0x2d   : > { %1875 = vmatmul.msk.bf16.gmra.mxu0 %vm400_vm1, %v372_v57 }
  0x2e   : > { %1911 = vmatmul.msk.bf16.gmra.mxu3 %vm400_vm1, %v694_v56 }
  0x31   : > { %1366 = vperm.xlu0 %2005, %v2157_v11  }
  0x32   : > { %1370 = vperm.xlu1 %2006, %v2135_v6   ;;  %v580_v6 = vshrl.u32 %v1955_v45, 16 }
  0x34   : > { %1904 = vmatmul.msk.bf16.gmra.mxu2 %vm400_vm1, %v579_v61  ;;  %v582_v11 = vor.u32 %v580_v6, %v578_v59  ;;  %1374 = vperm.xlu2 %2007, %v2167_v12   ;;  %v686_v12 = vunpack.c.l.b16 %v680_v30  ;;  %v604_v61 = vshrl.u32 %v559_v44, 16 }
  0x36   : > { %1882 = vmatmul.msk.bf16.gmra.mxu1 %vm400_vm1, %v1950_v42  ;;  %v587_v17 = vsel %vm352_vm3, %v582_v11, %v586_v14  ;;  %v688_v39 = vpack.c.b16 %v686_v12, %v552_v34  ;;  %v1930_v42 = vld [vmem:[%s2612_s5 + $0x4] sm:$0x3]  ;;  %v606_v62 = vor.u32 %v604_v61, %v602_v58 }
  0x37   : > { %v1179_v45 = vsel %vm1009_vm4, %v1930_v42, 0 }
  0x38   : > { %1188 = vmatpush.bf16.msrb.mxu2 %v1179_v45  ;;  %v699_v50 = vrot.slane %v688_v39, 1 }
  0x39   : > { %1407 = vperm.xlu0 %2005, %v306_v2  }
  0x3a   : > { %1378 = vperm.xlu1 %2006, %v2145_v9   ;;  %v1957_v9 = vld [vmem:[%s2162_s26 + $0x24] sm:$0xff] }
  0x3b   : > { %v697_v20 = vrot.slane %v1957_v9, 1  ;;  %v592_v23 = vshll.u32 %v1957_v9, 16  ;;  %v596_v53 = vshrl.u32 %v1957_v9, 16 }
  0x3c   : > { %1382 = vperm.xlu2 %2007, %v2172_v13   ;;  %v1262_v13 = vsel %vm1009_vm4, %v1937_v43, 0 }
  0x3d   : > { %1876 = vmatmul.msk.bf16.gmra.mxu0 %vm400_vm1, %v380_v10  ;;  %v698_v25 = vsel %vm689_vm2, %v695_v3, %v697_v20  ;;  %v594_v27 = vrot.slane %v592_v23, 1  ;;  %1271 = vmatpush.bf16.msrb.mxu3 %v1262_v13  ;;  %v700_v55 = vsel %vm689_vm2, %v697_v20, %v699_v50 }
  0x3e   : > { %1912 = vmatmul.msk.bf16.gmra.mxu3 %vm400_vm1, %v696_v8  ;;  %v2285_v8 = vld [vmem:[%s2611_s4] ss:$0 sm:$0xff] }
  0x3f   : > { %v595_v36 = vsel %vm352_vm3, %v590_v29, %v594_v27  ;;  %v598_v57 = vor.u32 %v596_v53, %v594_v27 }
  0x41   : > { %1386 = vperm.xlu0 %2005, %v299_v48   ;;  %v1011_v48 = vsel %vm1009_vm4, %v1917_v46, 0  ;;  %v603_v59 = vsel %vm352_vm3, %v598_v57, %v602_v58 }
  0x42   : > { %1390 = vperm.xlu1 %2006, %v2189_v38   ;;  %v389_v38 = vshrl.u32 %v1952_v16, 16  ;;  %1020 = vmatpush.bf16.msrb.mxu0 %v1011_v48 }
  0x44   : > { %1905 = vmatmul.msk.bf16.gmra.mxu2 %vm400_vm1, %v587_v17  ;;  %v391_v51 = vor.u32 %v389_v38, %v387_v22  ;;  %1394 = vperm.xlu2 %2007, %v2196_v41   ;;  %v2291_v22 = vstv %s1916_s15 }
  0x46   : > { %1883 = vmatmul.msk.bf16.gmra.mxu1 %vm400_vm1, %v1951_v60  ;;  %v396_v56 = vsel %vm352_vm3, %v391_v51, %v395_v52  ;;  %v397_v60 = vshrl.u32 %v1873_v35, 16 }
  0x48   : > { %v399_v41 = vor.u32 %v397_v60, %v395_v52 }
  0x49   : > { %1398 = vperm.xlu0 %2005, %v302_v1  }
  0x4a   : > { %1402 = vperm.xlu1 %2006, %v303_v49   ;;  %v1064_v49 = vsel %vm1009_vm4, %v913_v47, 0 }
  0x4b   : > { %1073 = vmatpush.bf16.msrb.mxu1 %v1064_v49 }
  0x4d   : > { %1877 = vmatmul.msk.bf16.gmra.mxu0 %vm400_vm1, %v388_v26 }
  0x4e   : > { %1913 = vmatmul.msk.bf16.gmra.mxu3 %vm400_vm1, %v698_v25 }
  0x54   : > { %1906 = vmatmul.msk.bf16.gmra.mxu2 %vm400_vm1, %v595_v36 }
  0x56   : > { %1884 = vmatmul.msk.bf16.gmra.mxu1 %vm400_vm1, %v1952_v16  ;;  %v2288_v16 = vstv %s801_s12 }
  0x5d   : > { %1878 = vmatmul.msk.bf16.gmra.mxu0 %vm400_vm1, %v396_v56 }
  0x5e   : > { %1914 = vmatmul.msk.bf16.gmra.mxu3 %vm400_vm1, %v700_v55 }
  0x64   : > { %1907 = vmatmul.msk.bf16.gmra.mxu2 %vm400_vm1, %v603_v59 }
  0x66   : > { %1885 = vmatmul.msk.bf16.gmra.mxu1 %vm400_vm1, %v1873_v35 }
  0x6d   : > { %1879 = vmatmul.msk.bf16.gmra.mxu0 %vm400_vm1, %v399_v41 }
  0x6e   : > { %1915 = vmatmul.msk.bf16.gmra.mxu3 %vm400_vm1, %v699_v50  ;;  %v832_v31 = vpop.permute.xlu2 %831 }
  0x74   : > { %1908 = vmatmul.msk.bf16.gmra.mxu2 %vm400_vm1, %v606_v62 }
  0x83   : > { %v837_v35 = vpop.permute.xlu0 %836 }
  0x8b   : > { %v842_v56 = vpop.permute.xlu0 %841 }
  0x93   : > { %v486_v63 = vpop.f32.mrf.mxu1 }
  0x9a   : > { %v432_v0 = vpop.f32.mrf.mxu0 }
  0x9b   : > { %v488_v1 = vpop.f32.mrf.mxu1  ;;  %v487_v3 = vadd.f32 %v486_v63, %v432_v0 }
  0xa1   : > { %v731_v2 = vpop.f32.mrf.mxu3 }
  0xa2   : > { %v434_v4 = vpop.f32.mrf.mxu0 }
  0xa3   : > { %v491_v5 = vpop.f32.mrf.mxu1  ;;  %v489_v9 = vadd.f32 %v488_v1, %v434_v4  ;;  %v847_v1 = vpop.permute.xlu1 %846 }
  0xa7   : > { %v637_v6 = vpop.f32.mrf.mxu2 }
  0xa8   : > { %v667_v7 = vadd.f32 %v637_v6, %v487_v3 }
  0xa9   : > { %v733_v11 = vpop.f32.mrf.mxu3 }
  0xaa   : > { %v761_v10 = vadd.f32 %v731_v2, %v667_v7  ;;  %v437_v15 = vpop.f32.mrf.mxu0 }
  0xab   : > { %v493_v17 = vpop.f32.mrf.mxu1  ;;  %v492_v26 = vadd.f32 %v491_v5, %v437_v15 }
  0xac   : > { %v777_v14 = vadd.f32 %v2285_v8, %v761_v10 }
  0xae   : > { %v789_v18 = vmax.f32 %v777_v14, 0.0 }
  0xaf   : > { %v639_v19 = vpop.f32.mrf.mxu2 }
  0xb0   : > { %v803_v20 = vmul.f32 %v2288_v16, %v789_v18  ;;  %v668_v21 = vadd.f32 %v639_v19, %v489_v9 }
  0xb1   : > { %v736_v24 = vpop.f32.mrf.mxu3 }
  0xb2   : > { %v762_v23 = vadd.f32 %v733_v11, %v668_v21  ;;  %v817_v25 = vadd.f32 %v2291_v22, %v803_v20  ;;  %v439_v28 = vpop.f32.mrf.mxu0 }
  0xb3   : > { %v496_v29 = vpop.f32.mrf.mxu1  ;;  %v494_v44 = vadd.f32 %v493_v17, %v439_v28 }
  0xb4   : > { %v778_v27 = vadd.f32 %v2285_v8, %v762_v23  ;;  %v889_v12 = vmul.f32 %v832_v31, %v817_v25 }
  0xb6   : > { %v790_v30 = vmax.f32 %v778_v27, 0.0  ;;  %v901_v43 = vpack.c.bf16 %v889_v12, %v889_v12 }
  0xb7   : > { %v642_v32 = vpop.f32.mrf.mxu2 }
  0xb8   : > { %v804_v33 = vmul.f32 %v2288_v16, %v790_v30  ;;  %v669_v34 = vadd.f32 %v642_v32, %v492_v26  ;;  %v927_v50 = vunpack.c.l.b16 %v901_v43  ;;  %v852_v30 = vpop.permute.xlu1 %851 }
  0xb9   : > { %v738_v38 = vpop.f32.mrf.mxu3 }
  0xba   : > { %v818_v36 = vadd.f32 %v2291_v22, %v804_v33  ;;  %v763_v37 = vadd.f32 %v736_v24, %v669_v34  ;;  %v442_v40 = vpop.f32.mrf.mxu0 }
  0xbb   : > { %v498_v46 = vpop.f32.mrf.mxu1  ;;  %v497_v57 = vadd.f32 %v496_v29, %v442_v40 }
  0xbc   : > { %v779_v39 = vadd.f32 %v2285_v8, %v763_v37  ;;  %v890_v42 = vmul.f32 %v837_v35, %v818_v36 }
  0xbe   : > { %v791_v45 = vmax.f32 %v779_v39, 0.0  ;;  %v902_v13 = vpack.c.bf16 %v890_v42, %v890_v42 }
  0xbf   : > { %v644_v47 = vpop.f32.mrf.mxu2 }
  0xc0   : > { %v805_v48 = vmul.f32 %v2288_v16, %v791_v45  ;;  %v670_v49 = vadd.f32 %v644_v47, %v494_v44  ;;  %v928_v51 = vunpack.c.l.b16 %v902_v13 }
  0xc1   : > { %v741_v53 = vpop.f32.mrf.mxu3 }
  0xc2   : > { %v764_v52 = vadd.f32 %v738_v38, %v670_v49  ;;  %v938_v54 = vpack.c.b16 %v928_v51, %v927_v50  ;;  %v819_v55 = vadd.f32 %v2291_v22, %v805_v48  ;;  %v444_v59 = vpop.f32.mrf.mxu0 }
  0xc3   : > { %v501_v0 = vpop.f32.mrf.mxu1  ;;  %v499_v14 = vadd.f32 %v498_v46, %v444_v59 }
  0xc4   : > { %v780_v58 = vadd.f32 %v2285_v8, %v764_v52  ;;  %1924 = vmatmul.msk.bf16.vlgmr.msrb.gmra.mxu1 %vm990_vm5, %v938_v54  ;;  %v891_v60 = vmul.f32 %v842_v56, %v819_v55  ;;  %v947_v9 = vshll.u32 %v938_v54, 16  ;;  %v945_v31 = vshrl.u32 %v938_v54, 16 }
  0xc6   : > { %v792_v41 = vmax.f32 %v780_v58, 0.0  ;;  %v903_v2 = vpack.c.bf16 %v891_v60, %v891_v60  ;;  %v949_v29 = vrot.slane %v947_v9, 1 }
  0xc7   : > { %v647_v61 = vpop.f32.mrf.mxu2 }
  0xc8   : > { %v806_v62 = vmul.f32 %v2288_v16, %v792_v41  ;;  %v671_v63 = vadd.f32 %v647_v61, %v497_v57  ;;  %v929_v11 = vunpack.c.l.b16 %v903_v2  ;;  %v950_v39 = vor.u32 %v949_v29, %v945_v31 }
  0xc9   : > { %v743_v4 = vpop.f32.mrf.mxu3 }
  0xca   : > { %v765_v3 = vadd.f32 %v741_v53, %v671_v63  ;;  %v820_v5 = vadd.f32 %v2291_v22, %v806_v62  ;;  %v447_v7 = vpop.f32.mrf.mxu0  ;;  %v1108_v23 = vpack.c.b16 %v929_v11, %v928_v51  ;;  %v857_v51 = vpop.permute.xlu2 %856 }
  0xcb   : > { %v503_v28 = vpop.f32.mrf.mxu1  ;;  %v502_v32 = vadd.f32 %v501_v0, %v447_v7 }
  0xcc   : > { %v781_v6 = vadd.f32 %v2285_v8, %v765_v3  ;;  %v892_v10 = vmul.f32 %v847_v1, %v820_v5  ;;  %v1117_v36 = vshll.u32 %v1108_v23, 16  ;;  %v1232_v52 = vrot.slane %v1108_v23, 1 }
  0xcd   : > { %v1115_v53 = vshrl.u32 %v1108_v23, 16 }
  0xce   : > { %v793_v15 = vmax.f32 %v781_v6, 0.0  ;;  %v904_v17 = vpack.c.bf16 %v892_v10, %v892_v10  ;;  %v1119_v46 = vrot.slane %v1117_v36, 1 }
  0xcf   : > { %v649_v18 = vpop.f32.mrf.mxu2 }
  0xd0   : > { %v807_v19 = vmul.f32 %v2288_v16, %v793_v15  ;;  %v672_v20 = vadd.f32 %v649_v18, %v499_v14  ;;  %v930_v21 = vunpack.c.l.b16 %v904_v17  ;;  %v1120_v41 = vor.u32 %v1119_v46, %v1115_v53 }
  0xd1   : > { %v746_v26 = vpop.f32.mrf.mxu3 }
  0xd2   : > { %v821_v24 = vadd.f32 %v2291_v22, %v807_v19  ;;  %v766_v25 = vadd.f32 %v743_v4, %v672_v20  ;;  %v2307_v27 = vpack.c.b16 %v930_v21, %v929_v11  ;;  %v449_v12 = vpop.f32.mrf.mxu0  ;;  %v862_v11 = vpop.permute.xlu0 %861 }
  0xd3   : > { %v506_v55 = vpop.f32.mrf.mxu1  ;;  %v504_v60 = vadd.f32 %v503_v28, %v449_v12  ;;  %v867_v12 = vpop.permute.xlu1 %866 }
  0xd4   : > { %v782_v33 = vadd.f32 %v2285_v8, %v766_v25  ;;  %v893_v34 = vmul.f32 %v852_v30, %v821_v24  ;;  %1925 = vmatmul.msk.bf16.gmra.mxu1 %vm990_vm5, %v2307_v27  ;;  %v952_v35 = vshll.u32 %v2307_v27, 16  ;;  %v956_v15 = vshrl.u32 %v2307_v27, 16 }
  0xd6   : > { %v794_v37 = vmax.f32 %v782_v33, 0.0  ;;  %v905_v38 = vpack.c.bf16 %v893_v34, %v893_v34  ;;  %v954_v40 = vrot.slane %v952_v35, 1 }
  0xd7   : > { %v652_v42 = vpop.f32.mrf.mxu2 }
  0xd8   : > { %v808_v43 = vmul.f32 %v2288_v16, %v794_v37  ;;  %v931_v44 = vunpack.c.l.b16 %v905_v38  ;;  %v673_v45 = vadd.f32 %v652_v42, %v502_v32  ;;  %v955_v13 = vsel %vm352_vm3, %v950_v39, %v954_v40 }
  0xd9   : > { %1918 = vmatmul.msk.bf16.vlgmr.msrb.gmra.mxu0 %vm990_vm5, %v955_v13  ;;  %v748_v49 = vpop.f32.mrf.mxu3  ;;  %v958_v25 = vor.u32 %v956_v15, %v954_v40 }
  0xda   : > { %v2316_v47 = vpack.c.b16 %v931_v44, %v930_v21  ;;  %v767_v48 = vadd.f32 %v746_v26, %v673_v45  ;;  %v822_v50 = vadd.f32 %v2291_v22, %v808_v43  ;;  %v452_v56 = vpop.f32.mrf.mxu0 }
  0xdb   : > { %v507_v17 = vadd.f32 %v506_v55, %v452_v56  ;;  %v508_v23 = vpop.f32.mrf.mxu1 }
  0xdc   : > { %v783_v54 = vadd.f32 %v2285_v8, %v767_v48  ;;  %v1233_v57 = vrot.slane %v2316_v47, 1  ;;  %v1122_v58 = vshll.u32 %v2316_v47, 16  ;;  %v894_v59 = vmul.f32 %v857_v51, %v822_v50 }
  0xdd   : > { %v1126_v35 = vshrl.u32 %v2316_v47, 16 }
  0xde   : > { %v795_v61 = vmax.f32 %v783_v54, 0.0  ;;  %v1234_v62 = vsel %vm689_vm2, %v1232_v52, %v1233_v57  ;;  %v1124_v63 = vrot.slane %v1122_v58, 1  ;;  %v906_v0 = vpack.c.bf16 %v894_v59, %v894_v59 }
  0xdf   : > { %v654_v1 = vpop.f32.mrf.mxu2  ;;  %1938 = vmatmul.msk.bf16.vlgmr.msrb.gmra.mxu3 %vm990_vm5, %v1234_v62 }
  0xe0   : > { %v809_v2 = vmul.f32 %v2288_v16, %v795_v61  ;;  %v674_v3 = vadd.f32 %v654_v1, %v504_v60  ;;  %v1125_v4 = vsel %vm352_vm3, %v1120_v41, %v1124_v63  ;;  %v932_v5 = vunpack.c.l.b16 %v906_v0 }
  0xe1   : > { %1931 = vmatmul.msk.bf16.vlgmr.msrb.gmra.mxu2 %vm990_vm5, %v1125_v4  ;;  %v751_v14 = vpop.f32.mrf.mxu3  ;;  %v1128_v43 = vor.u32 %v1126_v35, %v1124_v63 }
  0xe2   : > { %v823_v6 = vadd.f32 %v2291_v22, %v809_v2  ;;  %v768_v7 = vadd.f32 %v748_v49, %v674_v3  ;;  %v940_v10 = vpack.c.b16 %v932_v5, %v931_v44  ;;  %v454_v24 = vpop.f32.mrf.mxu0 }
  0xe3   : > { %v509_v40 = vadd.f32 %v508_v23, %v454_v24  ;;  %v511_v50 = vpop.f32.mrf.mxu1 }
  0xe4   : > { %v784_v9 = vadd.f32 %v2285_v8, %v768_v7  ;;  %v895_v18 = vmul.f32 %v862_v11, %v823_v6  ;;  %1926 = vmatmul.msk.bf16.gmra.mxu1 %vm990_vm5, %v940_v10  ;;  %v960_v19 = vshll.u32 %v940_v10, 16  ;;  %v964_v58 = vshrl.u32 %v940_v10, 16 }
  0xe6   : > { %v796_v20 = vmax.f32 %v784_v9, 0.0  ;;  %v907_v21 = vpack.c.bf16 %v895_v18, %v895_v18  ;;  %v962_v26 = vrot.slane %v960_v19, 1  ;;  %v877_v9 = vpop.permute.xlu0 %876 }
  0xe7   : > { %v657_v28 = vpop.f32.mrf.mxu2 }
  0xe8   : > { %v810_v29 = vmul.f32 %v2288_v16, %v796_v20  ;;  %v933_v30 = vunpack.c.l.b16 %v907_v21  ;;  %v675_v31 = vadd.f32 %v657_v28, %v507_v17  ;;  %v963_v27 = vsel %vm352_vm3, %v958_v25, %v962_v26 }
  0xe9   : > { %1919 = vmatmul.msk.bf16.gmra.mxu0 %vm990_vm5, %v963_v27  ;;  %v753_v42 = vpop.f32.mrf.mxu3  ;;  %v966_v0 = vor.u32 %v964_v58, %v962_v26 }
  0xea   : > { %v1110_v32 = vpack.c.b16 %v933_v30, %v932_v5  ;;  %v769_v33 = vadd.f32 %v751_v14, %v675_v31  ;;  %v824_v34 = vadd.f32 %v2291_v22, %v810_v29  ;;  %v457_v47 = vpop.f32.mrf.mxu0 }
  0xeb   : > { %v512_v59 = vadd.f32 %v511_v50, %v457_v47  ;;  %v513_v11 = vpop.f32.mrf.mxu1 }
  0xec   : > { %v785_v36 = vadd.f32 %v2285_v8, %v769_v33  ;;  %v1235_v37 = vrot.slane %v1110_v32, 1  ;;  %v1130_v38 = vshll.u32 %v1110_v32, 16  ;;  %v896_v39 = vmul.f32 %v867_v12, %v824_v34 }
  0xed   : > { %v1134_v18 = vshrl.u32 %v1110_v32, 16 }
  0xee   : > { %v797_v44 = vmax.f32 %v785_v36, 0.0  ;;  %v1236_v45 = vsel %vm689_vm2, %v1233_v57, %v1235_v37  ;;  %v1132_v13 = vrot.slane %v1130_v38, 1  ;;  %v908_v46 = vpack.c.bf16 %v896_v39, %v896_v39  ;;  %v872_v57 = vpop.permute.xlu2 %871  ;;  %v882_v39 = vpop.permute.xlu1 %881 }
  0xef   : > { %v659_v48 = vpop.f32.mrf.mxu2  ;;  %1939 = vmatmul.msk.bf16.gmra.mxu3 %vm990_vm5, %v1236_v45 }
  0xf0   : > { %v811_v49 = vmul.f32 %v2288_v16, %v797_v44  ;;  %v676_v51 = vadd.f32 %v659_v48, %v509_v40  ;;  %v1133_v52 = vsel %vm352_vm3, %v1128_v43, %v1132_v13  ;;  %v934_v53 = vunpack.c.l.b16 %v908_v46 }
  0xf1   : > { %1932 = vmatmul.msk.bf16.gmra.mxu2 %vm990_vm5, %v1133_v52  ;;  %v756_v2 = vpop.f32.mrf.mxu3  ;;  %v1136_v25 = vor.u32 %v1134_v18, %v1132_v13 }
  0xf2   : > { %v825_v54 = vadd.f32 %v2291_v22, %v811_v49  ;;  %v770_v55 = vadd.f32 %v753_v42, %v676_v51  ;;  %v941_v56 = vpack.c.b16 %v934_v53, %v933_v30  ;;  %v459_v14 = vpop.f32.mrf.mxu0 }
  0xf3   : > { %v514_v24 = vadd.f32 %v513_v11, %v459_v14 }
  0xf4   : > { %v786_v60 = vadd.f32 %v2285_v8, %v770_v55  ;;  %v897_v41 = vmul.f32 %v872_v57, %v825_v54  ;;  %1927 = vmatmul.msk.bf16.gmra.mxu1 %vm990_vm5, %v941_v56  ;;  %v968_v61 = vshll.u32 %v941_v56, 16  ;;  %v972_v42 = vshrl.u32 %v941_v56, 16 }
  0xf6   : > { %v798_v62 = vmax.f32 %v786_v60, 0.0  ;;  %v909_v63 = vpack.c.bf16 %v897_v41, %v897_v41  ;;  %v970_v1 = vrot.slane %v968_v61, 1 }
  0xf7   : > { %v662_v3 = vpop.f32.mrf.mxu2 }
  0xf8   : > { %v812_v4 = vmul.f32 %v2288_v16, %v798_v62  ;;  %v935_v5 = vunpack.c.l.b16 %v909_v63  ;;  %v677_v6 = vadd.f32 %v662_v3, %v512_v59  ;;  %v971_v7 = vsel %vm352_vm3, %v966_v0, %v970_v1 }
  0xf9   : > { %1920 = vmatmul.msk.bf16.gmra.mxu0 %vm990_vm5, %v971_v7  ;;  %v758_v12 = vpop.f32.mrf.mxu3  ;;  %v974_v13 = vor.u32 %v972_v42, %v970_v1 }
  0xfa   : > { %v1111_v10 = vpack.c.b16 %v935_v5, %v934_v53  ;;  %v771_v15 = vadd.f32 %v756_v2, %v677_v6  ;;  %v826_v17 = vadd.f32 %v2291_v22, %v812_v4 }
  0xfc   : > { %v787_v19 = vadd.f32 %v2285_v8, %v771_v15  ;;  %v1237_v20 = vrot.slane %v1111_v10, 1  ;;  %v1138_v21 = vshll.u32 %v1111_v10, 16  ;;  %v898_v23 = vmul.f32 %v877_v9, %v826_v17 }
  0xfd   : > { %v1142_v52 = vshrl.u32 %v1111_v10, 16 }
  0xfe   : > { %v799_v26 = vmax.f32 %v787_v19, 0.0  ;;  %v1238_v28 = vsel %vm689_vm2, %v1235_v37, %v1237_v20  ;;  %v1140_v29 = vrot.slane %v1138_v21, 1  ;;  %v910_v30 = vpack.c.bf16 %v898_v23, %v898_v23 }
  0xff   : > { %v664_v31 = vpop.f32.mrf.mxu2  ;;  %1940 = vmatmul.msk.bf16.gmra.mxu3 %vm990_vm5, %v1238_v28 }
 0x100   : > { %v813_v27 = vmul.f32 %v2288_v16, %v799_v26  ;;  %v678_v33 = vadd.f32 %v664_v31, %v514_v24  ;;  %v1141_v32 = vsel %vm352_vm3, %v1136_v25, %v1140_v29  ;;  %v936_v34 = vunpack.c.l.b16 %v910_v30 }
 0x101   : > { %1933 = vmatmul.msk.bf16.gmra.mxu2 %vm990_vm5, %v1141_v32  ;;  %v1144_v59 = vor.u32 %v1142_v52, %v1140_v29  ;;  %v2388_v52 = vstv %s1945_s19 }
 0x102   : > { %v827_v35 = vadd.f32 %v2291_v22, %v813_v27  ;;  %v772_v36 = vadd.f32 %v758_v12, %v678_v33  ;;  %v942_v38 = vpack.c.b16 %v936_v34, %v935_v5  ;;  %v2381_v12 = vld [vmem:[%s2613_s6] ss:$0 sm:$0xff] }
 0x104   : > { %v788_v37 = vadd.f32 %v2285_v8, %v772_v36  ;;  %v899_v40 = vmul.f32 %v882_v39, %v827_v35  ;;  %1928 = vmatmul.msk.bf16.gmra.mxu1 %vm990_vm5, %v942_v38  ;;  %v976_v43 = vshll.u32 %v942_v38, 16  ;;  %v887_v8 = vpop.permute.xlu2 %886 }
 0x106   : > { %v800_v44 = vmax.f32 %v788_v37, 0.0  ;;  %v911_v45 = vpack.c.bf16 %v899_v40, %v899_v40  ;;  %v978_v46 = vrot.slane %v976_v43, 1 }
 0x108   : > { %v814_v48 = vmul.f32 %v2288_v16, %v800_v44  ;;  %v937_v49 = vunpack.c.l.b16 %v911_v45  ;;  %v979_v50 = vsel %vm352_vm3, %v974_v13, %v978_v46  ;;  %v2384_v13 = vstv %s1944_s18 }
 0x109   : > { %1921 = vmatmul.msk.bf16.gmra.mxu0 %vm990_vm5, %v979_v50 }
 0x10a   : > { %v828_v47 = vadd.f32 %v2291_v22, %v814_v48  ;;  %v1112_v51 = vpack.c.b16 %v937_v49, %v936_v34  ;;  %v943_v56 = vpack.c.b16 %v937_v49, %v937_v49  ;;  %v980_v22 = vshrl.u32 %v942_v38, 16 }
 0x10c   : > { %v900_v53 = vmul.f32 %v887_v8, %v828_v47  ;;  %v1239_v54 = vrot.slane %v1112_v51, 1  ;;  %v1146_v55 = vshll.u32 %v1112_v51, 16  ;;  %v984_v41 = vshll.u32 %v943_v56, 16 }
 0x10d   : > { %v982_v0 = vor.u32 %v980_v22, %v978_v46  ;;  %v1150_v4 = vshrl.u32 %v1112_v51, 16  ;;  %v988_v11 = vshrl.u32 %v943_v56, 16 }
 0x10e   : > { %v912_v57 = vpack.c.bf16 %v900_v53, %v900_v53  ;;  %v1240_v58 = vsel %vm689_vm2, %v1237_v20, %v1239_v54  ;;  %v1148_v60 = vrot.slane %v1146_v55, 1  ;;  %v986_v62 = vrot.slane %v984_v41, 1 }
 0x10f   : > { %1941 = vmatmul.msk.bf16.gmra.mxu3 %vm990_vm5, %v1240_v58 }
 0x110   : > { %v1149_v16 = vsel %vm352_vm3, %v1144_v59, %v1148_v60  ;;  %v1107_v61 = vunpack.c.l.b16 %v912_v57  ;;  %v987_v1 = vsel %vm352_vm3, %v982_v0, %v986_v62  ;;  %v1152_v7 = vor.u32 %v1150_v4, %v1148_v60  ;;  %v2393_v59 = vpop.permute.xlu1 %1370  ;;  %v2395_v60 = vpop.permute.xlu2 %1374 }
 0x111   : > { %1934 = vmatmul.msk.bf16.gmra.mxu2 %vm990_vm5, %v1149_v16 }
 0x112   : > { %v1113_v63 = vpack.c.b16 %v1107_v61, %v1107_v61 }
 0x114   : > { %1929 = vmatmul.msk.bf16.gmra.mxu1 %vm990_vm5, %v943_v56  ;;  %v1154_v2 = vshll.u32 %v1113_v63, 16  ;;  %v1241_v3 = vrot.slane %v1113_v63, 1  ;;  %v1158_v14 = vshrl.u32 %v1113_v63, 16 }
 0x116   : > { %v1156_v5 = vrot.slane %v1154_v2, 1  ;;  %v1242_v6 = vsel %vm689_vm2, %v1239_v54, %v1241_v3 }
 0x118   : > { %v1157_v10 = vsel %vm352_vm3, %v1152_v7, %v1156_v5 }
 0x119   : > { %1922 = vmatmul.msk.bf16.gmra.mxu0 %vm990_vm5, %v987_v1 }
 0x11f   : > { %1942 = vmatmul.msk.bf16.gmra.mxu3 %vm990_vm5, %v1242_v6 }
 0x121   : > { %1935 = vmatmul.msk.bf16.gmra.mxu2 %vm990_vm5, %v1157_v10 }
 0x129   : > { %1923 = vmatmul.msk.bf16.gmra.mxu0 %vm990_vm5, %v988_v11 }
 0x12f   : > { %1943 = vmatmul.msk.bf16.gmra.mxu3 %vm990_vm5, %v1241_v3 }
 0x131   : > { %1936 = vmatmul.msk.bf16.gmra.mxu2 %vm990_vm5, %v1158_v14 }
 0x141   : > { %v1075_v15 = vpop.f32.mrf.mxu1 }
 0x149   : > { %v1077_v17 = vpop.f32.mrf.mxu1 }
 0x151   : > { %v1080_v9 = vpop.f32.mrf.mxu1 }
 0x156   : > { %v1022_v18 = vpop.f32.mrf.mxu0 }
 0x157   : > { %v1076_v19 = vadd.f32 %v1075_v15, %v1022_v18 }
 0x159   : > { %v1082_v20 = vpop.f32.mrf.mxu1 }
 0x15e   : > { %v1024_v21 = vpop.f32.mrf.mxu0 }
 0x15f   : > { %v1078_v27 = vadd.f32 %v1077_v17, %v1024_v21  ;;  %v2403_v17 = vpop.permute.xlu0 %1366 }
 0x161   : > { %v1085_v23 = vpop.f32.mrf.mxu1 }
 0x162   : > { %v1273_v24 = vpop.f32.mrf.mxu3 }
 0x164   : > { %v1190_v25 = vpop.f32.mrf.mxu2 }
 0x165   : > { %v1219_v26 = vadd.f32 %v1190_v25, %v1076_v19  ;;  %v2408_v25 = vpop.permute.xlu1 %1378 }
 0x166   : > { %v1027_v28 = vpop.f32.mrf.mxu0 }
 0x167   : > { %v2376_v29 = vadd.f32 %v1273_v24, %v1219_v26  ;;  %v1081_v37 = vadd.f32 %v1080_v9, %v1027_v28  ;;  %v2410_v26 = vpop.permute.xlu2 %1382 }
 0x169   : > { %v1087_v30 = vpop.f32.mrf.mxu1 }
 0x16a   : > { %v1275_v31 = vpop.f32.mrf.mxu3 }
 0x16c   : > { %v1192_v33 = vpop.f32.mrf.mxu2 }
 0x16d   : > { %v1220_v32 = vadd.f32 %v1192_v33, %v1078_v27 }
 0x16e   : > { %v1029_v34 = vpop.f32.mrf.mxu0 }
 0x16f   : > { %v1303_v35 = vadd.f32 %v1275_v31, %v1220_v32  ;;  %v1083_v47 = vadd.f32 %v1082_v20, %v1029_v34 }
 0x171   : > { %v1318_v36 = vadd.f32 %v2381_v12, %v1303_v35  ;;  %v1090_v38 = vpop.f32.mrf.mxu1 }
 0x172   : > { %v1278_v39 = vpop.f32.mrf.mxu3 }
 0x173   : > { %v1329_v42 = vmax.f32 %v1318_v36, 0.0 }
 0x174   : > { %v1195_v40 = vpop.f32.mrf.mxu2 }
 0x175   : > { %v1221_v43 = vadd.f32 %v1195_v40, %v1081_v37  ;;  %v1342_v46 = vmul.f32 %v2384_v13, %v1329_v42  ;;  %v2416_v37 = vpop.permute.xlu0 %1407 }
 0x176   : > { %v1032_v44 = vpop.f32.mrf.mxu0 }
 0x177   : > { %v1304_v45 = vadd.f32 %v1278_v39, %v1221_v43  ;;  %v1355_v55 = vadd.f32 %v2388_v52, %v1342_v46  ;;  %v1086_v63 = vadd.f32 %v1085_v23, %v1032_v44 }
 0x179   : > { %v1319_v48 = vadd.f32 %v2381_v12, %v1304_v45  ;;  %v1092_v49 = vpop.f32.mrf.mxu1  ;;  %v1411_v61 = vmul.f32 %v2393_v59, %v1355_v55 }
 0x17a   : > { %v1280_v50 = vpop.f32.mrf.mxu3 }
 0x17b   : > { %v1330_v51 = vmax.f32 %v1319_v48, 0.0 }
 0x17c   : > { %v1197_v8 = vpop.f32.mrf.mxu2 }
 0x17d   : > { %v1343_v53 = vmul.f32 %v2384_v13, %v1330_v51  ;;  %v1222_v54 = vadd.f32 %v1197_v8, %v1083_v47 }
 0x17e   : > { %v1034_v56 = vpop.f32.mrf.mxu0 }
 0x17f   : > { %v1305_v57 = vadd.f32 %v1280_v50, %v1222_v54  ;;  %v1356_v58 = vadd.f32 %v2388_v52, %v1343_v53  ;;  %v1088_v14 = vadd.f32 %v1087_v30, %v1034_v56  ;;  %v2423_v56 = vpop.permute.xlu0 %1386 }
 0x181   : > { %v1320_v16 = vadd.f32 %v2381_v12, %v1305_v57  ;;  %v1095_v41 = vpop.f32.mrf.mxu1  ;;  %v1412_v22 = vmul.f32 %v2395_v60, %v1356_v58  ;;  %v2425_v57 = vpop.permute.xlu1 %1390 }
 0x182   : > { %v1283_v62 = vpop.f32.mrf.mxu3 }
 0x183   : > { %v2008_v0 = vpack.i.bf16 %v1412_v22, %v1411_v61  ;;  %v1331_v2 = vmax.f32 %v1320_v16, 0.0 }
 0x184   : > { %v1200_v1 = vpop.f32.mrf.mxu2 }
 0x185   : > { %v1223_v3 = vadd.f32 %v1200_v1, %v1086_v63  ;;  %2009 = vrot.lane.b32.xlu0 %v2008_v0, %s2066_s20  ;;  %v1344_v6 = vmul.f32 %v2384_v13, %v1331_v2 }
 0x186   : > { %v1037_v4 = vpop.f32.mrf.mxu0 }
 0x187   : > { %v1306_v5 = vadd.f32 %v1283_v62, %v1223_v3  ;;  %v1357_v20 = vadd.f32 %v2388_v52, %v1344_v6  ;;  %v1091_v32 = vadd.f32 %v1090_v38, %v1037_v4 }
 0x189   : > { %v1321_v7 = vadd.f32 %v2381_v12, %v1306_v5  ;;  %v1097_v10 = vpop.f32.mrf.mxu1  ;;  %v1413_v31 = vmul.f32 %v2408_v25, %v1357_v20 }
 0x18a   : > { %v1285_v11 = vpop.f32.mrf.mxu3 }
 0x18b   : > { %v1332_v15 = vmax.f32 %v1321_v7, 0.0 }
 0x18c   : > { %v1202_v9 = vpop.f32.mrf.mxu2 }
 0x18d   : > { %v1345_v18 = vmul.f32 %v2384_v13, %v1332_v15  ;;  %v1224_v19 = vadd.f32 %v1202_v9, %v1088_v14 }
 0x18e   : > { %v1039_v21 = vpop.f32.mrf.mxu0 }
 0x18f   : > { %v1307_v23 = vadd.f32 %v1285_v11, %v1224_v19  ;;  %v1358_v24 = vadd.f32 %v2388_v52, %v1345_v18  ;;  %v1093_v48 = vadd.f32 %v1092_v49, %v1039_v21  ;;  %v2435_v21 = vpop.permute.xlu0 %1398 }
 0x191   : > { %v1322_v28 = vadd.f32 %v2381_v12, %v1307_v23  ;;  %v1100_v30 = vpop.f32.mrf.mxu1  ;;  %v1414_v27 = vmul.f32 %v2410_v26, %v1358_v24  ;;  %v2437_v23 = vpop.permute.xlu2 %1394  ;;  %v1317_v24 = vadd.f32 %v2381_v12, %v2376_v29 }
 0x192   : > { %v1288_v33 = vpop.f32.mrf.mxu3 }
 0x193   : > { %v2013_v34 = vpack.i.bf16 %v1414_v27, %v1413_v31  ;;  %v1333_v36 = vmax.f32 %v1322_v28, 0.0 }
 0x194   : > { %v1205_v35 = vpop.f32.mrf.mxu2 }
 0x195   : > { %v1225_v39 = vadd.f32 %v1205_v35, %v1091_v32  ;;  %2014 = vrot.lane.b32.xlu1 %v2013_v34, %s2066_s20  ;;  %v1346_v43 = vmul.f32 %v2384_v13, %v1333_v36  ;;  %v1328_v36 = vmax.f32 %v1317_v24, 0.0 }
 0x196   : > { %v1042_v40 = vpop.f32.mrf.mxu0 }
 0x197   : > { %v1308_v42 = vadd.f32 %v1288_v33, %v1225_v39  ;;  %v1359_v8 = vadd.f32 %v2388_v52, %v1346_v43  ;;  %v1096_v22 = vadd.f32 %v1095_v41, %v1042_v40  ;;  %v2447_v43 = vpop.permute.xlu1 %1402 }
 0x199   : > { %v1323_v44 = vadd.f32 %v2381_v12, %v1308_v42  ;;  %v1102_v45 = vpop.f32.mrf.mxu1  ;;  %v1415_v16 = vmul.f32 %v2423_v56, %v1359_v8 }
 0x19a   : > { %v1290_v46 = vpop.f32.mrf.mxu3 }
 0x19b   : > { %v1334_v50 = vmax.f32 %v1323_v44, 0.0  ;;  %v1341_v44 = vmul.f32 %v2384_v13, %v1328_v36  ;;  %v2489_v36 = vld [vmem:[%s2162_s26 + $0x18] sm:$0xff]  }
 0x19c   : > { %v1207_v47 = vpop.f32.mrf.mxu2 }
 0x19d   : > { %v1347_v38 = vmul.f32 %v2384_v13, %v1334_v50  ;;  %v1226_v51 = vadd.f32 %v1207_v47, %v1093_v48 }
 0x19e   : > { %v1044_v53 = vpop.f32.mrf.mxu0 }
 0x19f   : > { %v1309_v54 = vadd.f32 %v1290_v46, %v1226_v51  ;;  %v1360_v55 = vadd.f32 %v2388_v52, %v1347_v38  ;;  %v1098_v7 = vadd.f32 %v1097_v10, %v1044_v53  ;;  %v1354_v38 = vadd.f32 %v2388_v52, %v1341_v44 }
 0x1a1   : > { %v1324_v58 = vadd.f32 %v2381_v12, %v1309_v54  ;;  %v1416_v49 = vmul.f32 %v2425_v57, %v1360_v55  ;;  %v1410_v8 = vmul.f32 %v2403_v17, %v1354_v38  ;;  %v1978_v54 = vld [vmem:[%s2162_s26 + $0x8] sm:$0xff]   ;;  %v2462_v55 = vld [vmem:[%s2162_s26] sm:$0xff]  }
 0x1a2   : > { %v1293_v61 = vpop.f32.mrf.mxu3 }
 0x1a3   : > { %v2023_v62 = vpack.i.bf16 %v1416_v49, %v1415_v16  ;;  %v1335_v0 = vmax.f32 %v1324_v58, 0.0  ;;  %v1964_v58 = vunpack.c.l.bf16 %v1978_v54  ;;  %v1965_v16 = vunpack.c.h.bf16 %v1978_v54 }
 0x1a4   : > { %v1210_v63 = vpop.f32.mrf.mxu2 }
 0x1a5   : > { %v1227_v1 = vadd.f32 %v1210_v63, %v1096_v22  ;;  %v1348_v4 = vmul.f32 %v2384_v13, %v1335_v0  ;;  %v1458_v49 = vrot.slane %v1964_v58, 1  ;;  %v311_v22 = vld [vmem:[%s2162_s26 + $0x10] sm:$0xff]   ;;  %v2036_v0 = vld [vmem:[%s2162_s26 + $0x4] sm:$0xff]  }
 0x1a6   : > { %v1047_v2 = vpop.f32.mrf.mxu0 }
 0x1a7   : > { %v1310_v3 = vadd.f32 %v1293_v61, %v1227_v1  ;;  %v1361_v18 = vadd.f32 %v2388_v52, %v1348_v4  ;;  %v1101_v33 = vadd.f32 %v1100_v30, %v1047_v2  ;;  %v2035_v61 = vld [vmem:[%s2162_s26 + $0x8] sm:$0xff]   ;;  %v1522_v1 = vunpack.c.h.bf16 %v2036_v0 }
 0x1a8   : > { %v1460_v2 = vrot.slane %v1965_v16, 1 }
 0x1a9   : > { %v1325_v5 = vadd.f32 %v2381_v12, %v1310_v3  ;;  %v1417_v28 = vmul.f32 %v2437_v23, %v1361_v18  ;;  %v1524_v3 = vunpack.c.l.bf16 %v311_v22 }
 0x1aa   : > { %v1295_v6 = vpop.f32.mrf.mxu3 }
 0x1ab   : > { %v1336_v11 = vmax.f32 %v1325_v5, 0.0  ;;  %v1461_v5 = vsel %vm689_vm2, %v1458_v49, %v1460_v2  ;;  %v1619_v24 = vrot.slane %v1524_v3, 2 }
 0x1ac   : > { %v1212_v14 = vpop.f32.mrf.mxu2 }
 0x1ad   : > { %v1349_v15 = vmul.f32 %v2384_v13, %v1336_v11  ;;  %v1228_v9 = vadd.f32 %v1212_v14, %v1098_v7  ;;  %v1548_v11 = vrot.slane %v1524_v3, 1 }
 0x1ae   : > { %v1049_v41 = vpop.f32.mrf.mxu0 }
 0x1af   : > { %v1311_v19 = vadd.f32 %v1295_v6, %v1228_v9  ;;  %v1362_v20 = vadd.f32 %v2388_v52, %v1349_v15  ;;  %v2473_v6 = vrot.slane %v1522_v1, 1  ;;  %v1489_v9 = vmax.f32 %v1964_v58, %v1461_v5  ;;  %v308_v5 = vld [vmem:[%s2162_s26 + $0x4] sm:$0xf] }
 0x1b0   : > { %v2478_v41 = vrot.slane %v1522_v1, 2 }
 0x1b1   : > { %v1326_v10 = vadd.f32 %v2381_v12, %v1311_v19  ;;  %v1418_v31 = vmul.f32 %v2435_v21, %v1362_v20  ;;  %v2481_v20 = vld [vmem:[%s2162_s26 + $0x10] sm:$0xff]  }
 0x1b2   : > { %v1298_v27 = vpop.f32.mrf.mxu3 }
 0x1b3   : > { %v1337_v32 = vmax.f32 %v1326_v10, 0.0  ;;  %v2028_v34 = vpack.i.bf16 %v1418_v31, %v1417_v28  ;;  %v1968_v28 = vunpack.c.l.bf16 %v2481_v20 }
 0x1b4   : > { %v1215_v35 = vpop.f32.mrf.mxu2 }
 0x1b5   : > { %v1350_v39 = vmul.f32 %v2384_v13, %v1337_v32  ;;  %v1229_v40 = vadd.f32 %v1215_v35, %v1101_v33  ;;  %2029 = vrot.lane.b32.xlu0 %v2028_v34, %s2066_s20  ;;  %v1969_v32 = vunpack.c.h.bf16 %v2481_v20  ;;  %v1462_v34 = vrot.slane %v1968_v28, 1 }
 0x1b6   : > { %v1525_v35 = vunpack.c.h.bf16 %v311_v22 }
 0x1b7   : > { %v1312_v42 = vadd.f32 %v1298_v27, %v1229_v40  ;;  %v1363_v29 = vadd.f32 %v2388_v52, %v1350_v39  ;;  %v1463_v44 = vsel %vm689_vm2, %v1460_v2, %v1462_v34 }
 0x1b9   : > { %v1327_v30 = vadd.f32 %v2381_v12, %v1312_v42  ;;  %v1419_v45 = vmul.f32 %v2447_v43, %v1363_v29  ;;  %v2493_v42 = vrot.slane %v1969_v32, 1  ;;  %v1526_v29 = vunpack.c.l.bf16 %v2489_v36 }
 0x1ba   : > { %v1300_v46 = vpop.f32.mrf.mxu3 }
 0x1bb   : > { %v1338_v48 = vmax.f32 %v1327_v30, 0.0  ;;  %1719 = vrot.lane.b32.xlu1 %v1419_v45, %s2066_s20  ;;  %v1550_v30 = vrot.slane %v1525_v35, 1  ;;  %v1465_v46 = vsel %vm689_vm2, %v1462_v34, %v2493_v42 }
 0x1bc   : > { %v1217_v50 = vpop.f32.mrf.mxu2 }
 0x1bd   : > { %v1351_v47 = vmul.f32 %v2384_v13, %v1338_v48  ;;  %v1961_v13 = vunpack.c.h.bf16 %v2462_v55  ;;  %v1490_v50 = vmax.f32 %v1965_v16, %v1463_v44  ;;  %v1551_v38 = vsel %vm689_vm2, %v1548_v11, %v1550_v30 }
 0x1bf   : > { %v1364_v51 = vadd.f32 %v2388_v52, %v1351_v47  ;;  %v1523_v52 = vunpack.c.h.bf16 %v2035_v61  ;;  %v2467_v63 = vrot.slane %v1961_v13, 1  ;;  %v2499_v47 = vrot.slane %v1526_v29, 1 }
 0x1c0   : > { %v1578_v58 = vmax.f32 %v1490_v50, %v1551_v38  ;;  %v317_v38 = vld [vmem:[%s2162_s26 + $0x28] sm:$0xf] }
 0x1c1   : > { %v1420_v12 = vmul.f32 %v2416_v37, %v1364_v51  ;;  %v1546_v4 = vrot.slane %v1523_v52, 1  ;;  %v1617_v15 = vrot.slane %v1523_v52, 2 }
 0x1c3   : > { %v2018_v53 = vpack.i.bf16 %v1410_v8, %v1420_v12  ;;  %v1547_v14 = vsel %vm689_vm2, %v2473_v6, %v1546_v4  ;;  %v1549_v18 = vsel %vm689_vm2, %v1546_v4, %v1548_v11  ;;  %v1618_v10 = vsel %vm1613_vm6, %v2478_v41, %v1617_v15  ;;  %v1431_v11 = vld [vmem:[%s2162_s26 + $0x28] sm:$0x1] }
 0x1c4   : > { %v1577_v31 = vmax.f32 %v1489_v9, %v1549_v18  ;;  %v1620_v27 = vsel %vm1613_vm6, %v1617_v15, %v1619_v24  ;;  %v1491_v8 = vmax.f32 %v1968_v28, %v1465_v46  ;;  %v1621_v12 = vrot.slane %v1525_v35, 2  ;;  %v2527_v18 = vld [vmem:[%s2162_s26 + $0x18] sm:$0xff]   ;;  %v2531_v28 = vld [vmem:[%s2162_s26 + $0x20] sm:$0xff]  }
 0x1c5   : > { %2019 = vrot.lane.b32.xlu2 %v2018_v53, %s2066_s20  ;;  %v1553_v53 = vsel %vm689_vm2, %v1550_v30, %v2499_v47  ;;  %v1521_v9 = vunpack.c.l.bf16 %v308_v5  ;;  %v1972_v34 = vunpack.c.l.bf16 %v2527_v18  ;;  %v1977_v46 = vunpack.c.h.bf16 %v2531_v28 }
 0x1c6   : > { %v1648_v39 = vmax.f32 %v1577_v31, %v1620_v27  ;;  %v1579_v16 = vmax.f32 %v1491_v8, %v1553_v53  ;;  %v1622_v0 = vsel %vm1613_vm6, %v1619_v24, %v1621_v12  ;;  %v1597_v24 = vld [vmem:[%s2162_s26 + $0x4] sm:$0xe]  ;;  %v1509_v31 = vld [vmem:[%s2162_s26 + $0x2c] sm:$0x1] }
 0x1c7   : > { %v1543_v35 = vrot.slane %v1521_v9, 1  ;;  %v1531_v30 = vunpack.c.l.bf16 %v1509_v31  ;;  %v318_v53 = vld [vmem:[%s2162_s26 + $0x2c] sm:$0x3] }
 0x1c8   : > { %v1659_v45 = vpack.c.bf16 %v1648_v39, %v1648_v39  ;;  %v1609_v39 = vunpack.c.l.bf16 %v1597_v24 }
 0x1ca   : > { %v1670_v51 = vunpack.c.l.bf16 %v1659_v45  ;;  %v315_v45 = vld [vmem:[%s2162_s26 + $0x20] sm:$0xff]  }
 0x1cc   : > { %v1681_v61 = vmul.f32 %v1670_v51, %v2395_v60 }
 0x1cd   : > { %2024 = vrot.lane.b32.xlu2 %v2023_v62, %s2066_s20  ;;  %v1459_v62 = vsel %vm689_vm2, %v2467_v63, %v1458_v49 }
 0x1ce   : > { %v1488_v7 = vmax.f32 %v1961_v13, %v1459_v62  ;;  %v2506_v13 = vrot.slane %v1526_v29, 2  ;;  %v1649_v62 = vmax.f32 %v1578_v58, %v1622_v0  ;;  %v1527_v58 = vunpack.c.h.bf16 %v2489_v36 }
 0x1cf   : > { %v1530_v0 = vunpack.c.l.bf16 %v317_v38  ;;  %v1545_v36 = vsel %vm689_vm2, %v1543_v35, %v2473_v6 }
 0x1d0   : > { %v1576_v19 = vmax.f32 %v1488_v7, %v1547_v14  ;;  %v1624_v1 = vsel %vm1613_vm6, %v1621_v12, %v2506_v13  ;;  %v1960_v7 = vunpack.c.l.bf16 %v2462_v55  ;;  %v1660_v14 = vpack.c.bf16 %v1649_v62, %v1649_v62 }
 0x1d1   : > { %v1650_v4 = vmax.f32 %v1579_v16, %v1624_v1  ;;  %v1973_v55 = vunpack.c.h.bf16 %v2527_v18  ;;  %v1529_v16 = vunpack.c.h.bf16 %v315_v45  ;;  %v1614_v62 = vrot.slane %v1609_v39, 2 }
 0x1d2   : > { %v1647_v33 = vmax.f32 %v1576_v19, %v1618_v10  ;;  %v1455_v19 = vrot.slane %v1960_v7, 1  ;;  %v1442_v10 = vunpack.c.l.bf16 %v1431_v11  ;;  %v1671_v27 = vunpack.c.l.bf16 %v1660_v14 }
 0x1d3   : > { %v1661_v15 = vpack.c.bf16 %v1650_v4, %v1650_v4  ;;  %v1554_v4 = vrot.slane %v1527_v58, 1  ;;  %v1560_v9 = vrot.slane %v1530_v0, 1  ;;  %v1625_v31 = vrot.slane %v1527_v58, 2 }
 0x1d4   : > { %v1658_v40 = vpack.c.bf16 %v1647_v33, %v1647_v33  ;;  %v1457_v29 = vsel %vm689_vm2, %v1455_v19, %v2467_v63  ;;  %v1474_v44 = vrot.slane %v1442_v10, 1  ;;  %v1682_v50 = vmul.f32 %v1671_v27, %v2408_v25 }
 0x1d5   : > { %v1672_v33 = vunpack.c.l.bf16 %v1661_v15  ;;  %v1472_v25 = vrot.slane %v1977_v46, 1  ;;  %v1558_v15 = vrot.slane %v1529_v16, 1 }
 0x1d6   : > { %v1669_v48 = vunpack.c.l.bf16 %v1658_v40  ;;  %v1976_v40 = vunpack.c.l.bf16 %v2531_v28  ;;  %v1555_v28 = vsel %vm689_vm2, %v2499_v47, %v1554_v4  ;;  %v1626_v47 = vsel %vm1613_vm6, %v2506_v13, %v1625_v31 }
 0x1d7   : > { %v1683_v51 = vmul.f32 %v1672_v33, %v2410_v26 }
 0x1d8   : > { %v1680_v54 = vmul.f32 %v1669_v48, %v2393_v59  ;;  %v1470_v63 = vrot.slane %v1976_v40, 1 }
 0x1f7   : > { %v2010_v49 = vpop.permute.xlu0 %2009 }
 0x1f8   : > { %v2012_v52 = vunpack.i.h.bf16 %v2010_v49  ;;  %v2011_v22 = vunpack.i.l.bf16 %v2010_v49  ;;  %v1468_v49 = vrot.slane %v1973_v55, 1 }
 0x1fa   : > { %v1736_v59 = vsel %vm400_vm1, %v1681_v61, %v2012_v52  ;;  %v1735_v60 = vsel %vm400_vm1, %v1680_v54, %v2011_v22  ;;  %v1466_v54 = vrot.slane %v1972_v34, 1  ;;  %v1528_v61 = vunpack.c.l.bf16 %v315_v45 }
 0x1fb   : > { %v1747_v2 = vpack.c.bf16 %v1736_v59, %v1736_v59  ;;  %v1746_v3 = vpack.c.bf16 %v1735_v60, %v1735_v60  ;;  %v1487_v59 = vmax.f32 %v1960_v7, %v1457_v29  ;;  %v1497_v60 = vmax.f32 %v1442_v10, %v1474_v44 }
 0x1fc   : > { %v1467_v5 = vsel %vm689_vm2, %v2493_v42, %v1466_v54  ;;  %v1556_v11 = vrot.slane %v1528_v61, 1  ;;  %v1469_v14 = vsel %vm689_vm2, %v1466_v54, %v1468_v49  ;;  %v1473_v7 = vsel %vm689_vm2, %v1470_v63, %v1472_v25 }
 0x1fd   : > { %1759 = vst.msk [vmem:[%s2515_s23 + $0x8] sm:$0xf] %vm1756_vm7, %v1747_v2  ;;  %v1562_v2 = vrot.slane %v1531_v30, 1  ;;  %v1575_v18 = vmax.f32 %v1487_v59, %v1545_v36  ;;  %v1471_v6 = vsel %vm689_vm2, %v1468_v49, %v1470_v63  ;;  %v1616_v10 = vsel %vm1613_vm6, %v1614_v62, %v2478_v41 }
 0x1fe   : > { %1758 = vst.msk [vmem:[%s2515_s23 + $0x4] sm:$0xf] %vm1756_vm7, %v1746_v3  ;;  %v1610_v3 = vunpack.c.l.bf16 %v318_v53  ;;  %v1492_v42 = vmax.f32 %v1969_v32, %v1467_v5  ;;  %v1493_v27 = vmax.f32 %v1972_v34, %v1469_v14  ;;  %v1557_v33 = vsel %vm689_vm2, %v1554_v4, %v1556_v11  ;;  %v1770_v14 = vld [vmem:[%s2515_s23 + $0x28] sm:$0x1] }
 0x1ff   : > { %v1585_v19 = vmax.f32 %v1497_v60, %v1562_v2  ;;  %v1627_v35 = vrot.slane %v1528_v61, 2  ;;  %v1495_v39 = vmax.f32 %v1976_v40, %v1473_v7  ;;  %v1561_v29 = vsel %vm689_vm2, %v1558_v15, %v1560_v9 }
 0x200   : > { %v1633_v24 = vrot.slane %v1610_v3, 2  ;;  %v1629_v30 = vrot.slane %v1529_v16, 2  ;;  %v1631_v45 = vrot.slane %v1530_v0, 2  ;;  %v1475_v41 = vsel %vm689_vm2, %v1472_v25, %v1474_v44 }
 0x201   : > { %v1559_v20 = vsel %vm689_vm2, %v1556_v11, %v1558_v15  ;;  %v1580_v32 = vmax.f32 %v1492_v42, %v1555_v28  ;;  %v1581_v34 = vmax.f32 %v1493_v27, %v1557_v33  ;;  %v1563_v58 = vsel %vm689_vm2, %v1560_v9, %v1562_v2 }
 0x202   : > { %v1656_v38 = vmax.f32 %v1585_v19, %v1633_v24  ;;  %v1632_v40 = vsel %vm1613_vm6, %v1629_v30, %v1631_v45  ;;  %v1630_v44 = vsel %vm1613_vm6, %v1627_v35, %v1629_v30  ;;  %v1634_v25 = vsel %vm1613_vm6, %v1631_v45, %v1633_v24 }
 0x203   : > { %v1651_v49 = vmax.f32 %v1580_v32, %v1626_v47 }
 0x205   : > { %v1662_v0 = vpack.c.bf16 %v1651_v49, %v1651_v49 }
 0x207   : > { %v2015_v48 = vpop.permute.xlu1 %2014  ;;  %v1673_v4 = vunpack.c.l.bf16 %v1662_v0 }
 0x208   : > { %v2017_v8 = vunpack.i.h.bf16 %v2015_v48  ;;  %v2016_v12 = vunpack.i.l.bf16 %v2015_v48  ;;  %v1494_v48 = vmax.f32 %v1973_v55, %v1471_v6  ;;  %v1667_v55 = vpack.c.bf16 %v1656_v38, %v1656_v38 }
 0x20a   : > { %v1738_v52 = vsel %vm400_vm1, %v1683_v51, %v2017_v8  ;;  %v1737_v22 = vsel %vm400_vm1, %v1682_v50, %v2016_v12  ;;  %v1646_v50 = vmax.f32 %v1575_v18, %v1616_v10  ;;  %v1583_v51 = vmax.f32 %v1495_v39, %v1561_v29 }
 0x20b   : > { %v1749_v1 = vpack.c.bf16 %v1738_v52, %v1738_v52  ;;  %v1748_v26 = vpack.c.bf16 %v1737_v22, %v1737_v22  ;;  %v1628_v8 = vsel %vm1613_vm6, %v1625_v31, %v1627_v35  ;;  %v1496_v12 = vmax.f32 %v1977_v46, %v1475_v41 }
 0x20c   : > { %v1582_v53 = vmax.f32 %v1494_v48, %v1559_v20  ;;  %v1657_v54 = vpack.c.bf16 %v1646_v50, %v1646_v50  ;;  %v1652_v61 = vmax.f32 %v1581_v34, %v1628_v8  ;;  %v1654_v63 = vmax.f32 %v1583_v51, %v1632_v40 }
 0x20d   : > { %1761 = vst.msk [vmem:[%s2515_s23 + $0x10] sm:$0xf] %vm1756_vm7, %v1749_v1  ;;  %v1584_v16 = vmax.f32 %v1496_v12, %v1563_v58  ;;  %v1678_v22 = vunpack.c.l.bf16 %v1667_v55 }
 0x20e   : > { %1760 = vst.msk [vmem:[%s2515_s23 + $0xc] sm:$0xf] %vm1756_vm7, %v1748_v26  ;;  %v1653_v52 = vmax.f32 %v1582_v53, %v1630_v44  ;;  %v1668_v13 = vunpack.c.l.bf16 %v1657_v54  ;;  %v1663_v1 = vpack.c.bf16 %v1652_v61, %v1652_v61  ;;  %v1665_v46 = vpack.c.bf16 %v1654_v63, %v1654_v63 }
 0x20f   : > { %v1655_v26 = vmax.f32 %v1584_v16, %v1634_v25  ;;  %v1689_v3 = vmul.f32 %v1678_v22, %v2416_v37  ;;  %v1684_v37 = vmul.f32 %v1673_v4, %v2423_v56 }
 0x210   : > { %v1664_v59 = vpack.c.bf16 %v1653_v52, %v1653_v52  ;;  %v1679_v2 = vmul.f32 %v1668_v13, %v2403_v17  ;;  %v1674_v5 = vunpack.c.l.bf16 %v1663_v1  ;;  %v1676_v11 = vunpack.c.l.bf16 %v1665_v46 }
 0x211   : > { %v1666_v9 = vpack.c.bf16 %v1655_v26, %v1655_v26 }
 0x212   : > { %v1675_v18 = vunpack.c.l.bf16 %v1664_v59  ;;  %v1685_v6 = vmul.f32 %v1674_v5, %v2425_v57  ;;  %v1687_v10 = vmul.f32 %v1676_v11, %v2435_v21 }
 0x213   : > { %v1677_v42 = vunpack.c.l.bf16 %v1666_v9 }
 0x214   : > { %v1686_v28 = vmul.f32 %v1675_v18, %v2437_v23 }
 0x215   : > { %v1688_v50 = vmul.f32 %v1677_v42, %v2447_v43 }
 0x21f   : > { %v2020_v60 = vpop.permute.xlu2 %2019 }
 0x220   : > { %v2022_v36 = vunpack.i.h.bf16 %v2020_v60  ;;  %v2021_v62 = vunpack.i.l.bf16 %v2020_v60 }
 0x222   : > { %v1734_v7 = vsel %vm400_vm1, %v1679_v2, %v2022_v36  ;;  %v1744_v15 = vsel %vm400_vm1, %v1689_v3, %v2021_v62 }
 0x223   : > { %v1745_v19 = vpack.c.bf16 %v1734_v7, %v1734_v7  ;;  %v1755_v24 = vpack.c.bf16 %v1744_v15, %v1744_v15 }
 0x225   : > { %1757 = vst.msk [vmem:[%s2515_s23] sm:$0xf] %vm1756_vm7, %v1745_v19  ;;  %v1771_v17 = vsel %vm1769_vm10, %v1755_v24, %v1770_v14 }
 0x226   : > { %1772 = vst [vmem:[%s2515_s23 + $0x28] sm:$0x1] %v1771_v17 }
 0x227   : > { %v2030_v31 = vpop.permute.xlu0 %2029  ;;  %v2025_v27 = vpop.permute.xlu2 %2024 }
 0x228   : > { %v2032_v33 = vunpack.i.h.bf16 %v2030_v31  ;;  %v2031_v35 = vunpack.i.l.bf16 %v2030_v31  ;;  %v2027_v39 = vunpack.i.h.bf16 %v2025_v27  ;;  %v2026_v29 = vunpack.i.l.bf16 %v2025_v27 }
 0x22a   : > { %v1742_v56 = vsel %vm400_vm1, %v1687_v10, %v2032_v33  ;;  %v1741_v57 = vsel %vm400_vm1, %v1686_v28, %v2031_v35  ;;  %v1740_v21 = vsel %vm400_vm1, %v1685_v6, %v2027_v39  ;;  %v1739_v30 = vsel %vm400_vm1, %v1684_v37, %v2026_v29 }
 0x22b   : > { %v1753_v23 = vpack.c.bf16 %v1742_v56, %v1742_v56  ;;  %v1752_v45 = vpack.c.bf16 %v1741_v57, %v1741_v57  ;;  %v1751_v48 = vpack.c.bf16 %v1740_v21, %v1740_v21  ;;  %v1750_v38 = vpack.c.bf16 %v1739_v30, %v1739_v30 }
 0x22d   : > { %1765 = vst.msk [vmem:[%s2515_s23 + $0x20] sm:$0xf] %vm1756_vm7, %v1753_v23  ;;  %v1720_v41 = vpop.permute.xlu1 %1719 }
 0x22e   : > { %1764 = vst.msk [vmem:[%s2515_s23 + $0x1c] sm:$0xf] %vm1756_vm7, %v1752_v45  ;;  %v1743_v20 = vsel %vm400_vm1, %v1688_v50, %v1720_v41 }
 0x22f   : > { %1763 = vst.msk [vmem:[%s2515_s23 + $0x18] sm:$0xf] %vm1756_vm7, %v1751_v48  ;;  %v1754_v32 = vpack.c.bf16 %v1743_v20, %v1743_v20 }
 0x230   : > { %1762 = vst.msk [vmem:[%s2515_s23 + $0x14] sm:$0xf] %vm1756_vm7, %v1750_v38 }
 0x231   : > { %1766 = vst.msk [vmem:[%s2515_s23 + $0x24] sm:$0xf] %vm1756_vm7, %v1754_v32 }
 0x232 PF: > { %s18_s24 = sadd.s32 1, %s2062_s24  }
 0x233   : > { %p15_p7 = scmp.ge.s32.totalorder %s18_s24, 4  }
 0x235   :  { %17 = sbr.rel (!%p15_p7) target bundleno = 1 (0x1), region = 89 }
 0x23a   :  { %1794 = vsyncpa [#allocation3], 1 }
 0x23b   :  { %1796 = vsyncpa [#allocation3 + $0x1], 1 }

// kernel: stem_block.5
= control target key start
LH: loop header
LB: loop body
LE: loop exit
PB: predicated region body
PF: predicated region fallthrough
CT: control target
= control target key end

     0   :  { %11 = vsyncpa [#allocation4], 0  ;;  %s510_s0 = inlined_call_operand.vmem [shape: f32[4], index: 0, kind: input, shape index: {}]   ;;  %s511_s1 = inlined_call_operand.vmem [shape: bf16[32,144], index: 1, kind: input, shape index: {}]   ;;  %s512_s2 = inlined_call_operand.vmem [shape: bf16[144,8], index: 2, kind: input, shape index: {}]   ;;  %s513_s3 = inlined_call_operand.vmem [shape: f32[1,8], index: 3, kind: input, shape index: {}]   ;;  %s514_s4 = inlined_call_operand.vmem [shape: bf16[8,16], index: 4, kind: input, shape index: {}]   ;;  %s515_s5 = inlined_call_operand.vmem [shape: f32[1,16], index: 5, kind: input, shape index: {}]   ;;  %s516_s6 = inlined_call_operand.hbm [shape: f32[32,16], index: 6, kind: output, shape index: {}]  }
   0x1   :  { %12 = vsyncpa [#allocation3], 0  ;;  %s18_s23 = sshll.u32 %s510_s0, 4  ;;  %s399_s24 = smov [#allocation2]   ;;  %s19_s23 = int_to_ptr.vmem [resolvable:$true] %s18_s23 }
   0x2   :  { %21 = dma.vmem_to_smem %s19_s23, 16, %s399_s24, [#allocation4]  }
   0x3   :  { %395 = dma.done.wait [#allocation4], 16  }
   0x4   :  { %396 = vsyncadd [#allocation4], 4294967280 }
   0x5   :  { %36 = sfence }
   0x6   :  { %v343_v0 = vld [vmem:[%s512_s2 + $0x38] sm:$0xff]  ;;  %v342_v1 = vld [vmem:[%s512_s2 + $0x30] sm:$0xff]  ;;  %v344_v2 = vld [vmem:[%s512_s2 + $0x40] sm:$0xff]  ;;  %vm136_vm0 = vcmask 130048   ;;  %vm211_vm1 = vcmask 1043456   ;;  %s327_s12 = sld [smem:[#allocation2 + $0x1]] }
   0x7   :  { %143 = vmatpush.bf16.msra.mxu0 %v343_v0  ;;  %345 = vmatpush.bf16.msra.mxu3 %v343_v0  ;;  %v332_v3 = vld [vmem:[%s511_s1 + $0x4] sm:$0xf]  ;;  %v277_v4 = vld [vmem:[%s511_s1 + $0x8] sm:$0xf0]  ;;  %v339_v8 = vld [vmem:[%s512_s2 + $0x18] sm:$0xff]  ;;  %vm204_vm2 = vcmask 64512  }
   0x8   :  { %169 = vmatpush.bf16.msra.mxu1 %v344_v2  ;;  %v280_v5 = vor.u32 %v332_v3, %v277_v4  ;;  %v341_v6 = vld [vmem:[%s512_s2 + $0x28] sm:$0xff]  ;;  %v340_v7 = vld [vmem:[%s512_s2 + $0x20] sm:$0xff]  ;;  %v334_v9 = vld [vmem:[%s511_s1 + $0x14] sm:$0xf]  ;;  %s260_s18 = sshll.u32 %s516_s6, 4  ;;  %s401_s19 = smov 128   ;;  %s261_s18 = int_to_ptr.hbm [resolvable:$true] %s260_s18 }
   0x9   :  { %v285_v10 = vld [vmem:[%s511_s1 + $0x18] sm:$0xf0]  ;;  %v338_v11 = vld [vmem:[%s512_s2 + $0x10] sm:$0xff]  ;;  %v337_v13 = vld [vmem:[%s512_s2 + $0x8] sm:$0xff]  ;;  %s402_s20 = smov 8  }
   0xa   :  { %v288_v12 = vor.u32 %v334_v9, %v285_v10  ;;  %v336_v14 = vld [vmem:[%s512_s2] sm:$0xff]  ;;  %v333_v16 = vld [vmem:[%s511_s1 + $0x4] sm:$0xf0]  ;;  %v283_v17 = vld [vmem:[%s511_s1 + $0x10] sm:$0xf] }
   0xb   :  { %144 = vmatpush.bf16.msra.mxu0 %v342_v1  ;;  %346 = vmatpush.bf16.msra.mxu3 %v342_v1  ;;  %v275_v15 = vld [vmem:[%s511_s1] sm:$0xf]  ;;  %v335_v18 = vld [vmem:[%s511_s1 + $0x14] sm:$0xf0]  ;;  %s185_s1 = sld [smem:[#allocation2]] }
   0xc   :  { %325 = vmatmul.msk.bf16.vlgmr.msra.gmra.mxu1 %vm136_vm0, %v280_v5  ;;  %v276_v19 = vor.u32 %v333_v16, %v275_v15  ;;  %v284_v20 = vor.u32 %v335_v18, %v283_v17  ;;  %v199_v21 = vld [vmem:[%s514_s4] sm:$0xf]  ;;  %v192_v38 = vstv %s327_s12  ;;  %s331_s4 = sld [smem:[#allocation2 + $0x3]] }
   0xd   :  { %v213_v22 = vsel %vm211_vm1, %v199_v21, 0  ;;  %v357_v25 = vld [vmem:[%s513_s3] ss:$0 sm:$0xff]  ;;  %s330_s3 = sld [smem:[#allocation2 + $0x2]] }
   0xe   :  { %222 = vmatpush.bf16.msra.mxu2 %v213_v22  ;;  %v358_v56 = vld [vmem:[%s515_s5] ss:$0 sm:$0xff]  ;;  %s400_s5 = smov [#allocation5]  }
   0xf   :  { %145 = vmatpush.bf16.msra.mxu0 %v341_v6  ;;  %347 = vmatpush.bf16.msra.mxu3 %v341_v6  ;;  %s258_s15 = sshll.u32 %s400_s5, 4  ;;  %s259_s15 = int_to_ptr.vmem [resolvable:$true] %s258_s15 }
  0x11   :  { %v186_v34 = vstv %s185_s1 }
  0x12   :  { %v245_v61 = vstv %s331_s4 }
  0x13   :  { %146 = vmatpush.bf16.msra.mxu0 %v340_v7  ;;  %348 = vmatpush.bf16.msra.mxu3 %v340_v7  ;;  %v239_v59 = vstv %s330_s3 }
  0x17   :  { %147 = vmatpush.bf16.msra.mxu0 %v339_v8  ;;  %349 = vmatpush.bf16.msra.mxu3 %v339_v8 }
  0x1b   :  { %148 = vmatpush.bf16.msra.mxu0 %v338_v11  ;;  %350 = vmatpush.bf16.msra.mxu3 %v338_v11 }
  0x1c   :  { %326 = vmatmul.msk.bf16.gmra.mxu1 %vm136_vm0, %v288_v12 }
  0x1f   :  { %149 = vmatpush.bf16.msra.mxu0 %v337_v13  ;;  %351 = vmatpush.bf16.msra.mxu3 %v337_v13 }
  0x23   :  { %150 = vmatpush.bf16.msra.mxu0 %v336_v14  ;;  %352 = vmatpush.bf16.msra.mxu3 %v336_v14 }
  0x26   :  { %151 = vmatmul.bf16.vlgmr.msra.gmra.mxu0 %v276_v19  ;;  %156 = vmatmul.bf16.vlgmr.msra.gmra.mxu3 %v284_v20 }
  0x89   :  { %v171_v23 = vpop.f32.mrf.mxu1 }
  0x91   :  { %v173_v24 = vpop.f32.mrf.mxu1 }
  0x99   :  { %v176_v30 = vpop.f32.mrf.mxu1 }
  0xa1   :  { %v178_v43 = vpop.f32.mrf.mxu1 }
  0xa3   :  { %v152_v26 = vpop.f32.mrf.mxu0 }
  0xa4   :  { %v153_v27 = vadd.f32 %v357_v25, %v152_v26 }
  0xa6   :  { %v172_v28 = vadd.f32 %v171_v23, %v153_v27 }
  0xa8   :  { %v181_v32 = vmax.f32 %v172_v28, 0.0 }
  0xa9   :  { %v157_v29 = vpop.f32.mrf.mxu3 }
  0xaa   :  { %v187_v36 = vmul.f32 %v186_v34, %v181_v32  ;;  %v158_v41 = vadd.f32 %v357_v25, %v157_v29 }
  0xab   :  { %v154_v31 = vpop.f32.mrf.mxu0 }
  0xac   :  { %v155_v33 = vadd.f32 %v357_v25, %v154_v31  ;;  %v193_v44 = vadd.f32 %v192_v38, %v187_v36  ;;  %v177_v46 = vadd.f32 %v176_v30, %v158_v41 }
  0xae   :  { %v174_v35 = vadd.f32 %v173_v24, %v155_v33  ;;  %v183_v49 = vmax.f32 %v177_v46, 0.0 }
  0xb0   :  { %v182_v37 = vmax.f32 %v174_v35, 0.0  ;;  %v189_v51 = vmul.f32 %v186_v34, %v183_v49 }
  0xb1   :  { %v159_v39 = vpop.f32.mrf.mxu3 }
  0xb2   :  { %v188_v40 = vmul.f32 %v186_v34, %v182_v37  ;;  %v160_v42 = vadd.f32 %v357_v25, %v159_v39  ;;  %v195_v53 = vadd.f32 %v192_v38, %v189_v51 }
  0xb4   :  { %v194_v45 = vadd.f32 %v192_v38, %v188_v40  ;;  %v179_v47 = vadd.f32 %v178_v43, %v160_v42 }
  0xb6   :  { %v197_v48 = vpack.c.bf16 %v194_v45, %v193_v44  ;;  %v184_v50 = vmax.f32 %v179_v47, 0.0 }
  0xb8   :  { %328 = vmatmul.msk.bf16.vlgmr.msra.gmra.mxu2 %vm204_vm2, %v197_v48  ;;  %v190_v52 = vmul.f32 %v186_v34, %v184_v50 }
  0xba   :  { %v196_v54 = vadd.f32 %v192_v38, %v190_v52 }
  0xbc   :  { %v198_v55 = vpack.c.bf16 %v196_v54, %v195_v53 }
  0xc8   :  { %329 = vmatmul.msk.bf16.gmra.mxu2 %vm204_vm2, %v198_v55 }
 0x13b   :  { %v224_v57 = vpop.f32.mrf.mxu2 }
 0x13c   :  { %v225_v58 = vadd.f32 %v358_v56, %v224_v57 }
 0x13e   :  { %v234_v60 = vmax.f32 %v225_v58, 0.0 }
 0x140   :  { %v240_v62 = vmul.f32 %v239_v59, %v234_v60 }
 0x142   :  { %v246_v63 = vadd.f32 %v245_v61, %v240_v62 }
 0x143   :  { %v226_v0 = vpop.f32.mrf.mxu2 }
 0x144   :  { %250 = vst.msk [vmem:[#allocation5] sm:$0xff] %vm136_vm0, %v246_v63  ;;  %v227_v1 = vadd.f32 %v358_v56, %v226_v0 }
 0x146   :  { %v235_v2 = vmax.f32 %v227_v1, 0.0 }
 0x148   :  { %v241_v3 = vmul.f32 %v239_v59, %v235_v2 }
 0x14a   :  { %v247_v4 = vadd.f32 %v245_v61, %v241_v3 }
 0x14b   :  { %v229_v5 = vpop.f32.mrf.mxu2 }
 0x14c   :  { %251 = vst.msk [vmem:[#allocation5 + $0x8] sm:$0xff] %vm136_vm0, %v247_v4  ;;  %v230_v6 = vadd.f32 %v358_v56, %v229_v5 }
 0x14e   :  { %v236_v7 = vmax.f32 %v230_v6, 0.0 }
 0x150   :  { %v242_v8 = vmul.f32 %v239_v59, %v236_v7 }
 0x152   :  { %v248_v9 = vadd.f32 %v245_v61, %v242_v8 }
 0x153   :  { %v231_v10 = vpop.f32.mrf.mxu2 }
 0x154   :  { %252 = vst.msk [vmem:[#allocation5 + $0x10] sm:$0xff] %vm136_vm0, %v248_v9  ;;  %v232_v11 = vadd.f32 %v358_v56, %v231_v10 }
 0x156   :  { %v237_v12 = vmax.f32 %v232_v11, 0.0 }
 0x158   :  { %v243_v13 = vmul.f32 %v239_v59, %v237_v12 }
 0x15a   :  { %v249_v14 = vadd.f32 %v245_v61, %v243_v13 }
 0x15c   :  { %253 = vst.msk [vmem:[#allocation5 + $0x18] sm:$0xff] %vm136_vm0, %v249_v14 }
 0x15d   :  { %266 = dma.vmem_to_hbm [thread:$0]  %s259_s15, 512, %s261_s18, [#allocation3], %s401_s19, %s401_s19, %s402_s20  }
 0x15e   :  { %397 = dma.done.wait [#allocation3], 512  }
 0x15f   :  { %398 = vsyncadd [#allocation3], 4294966784 }
 0x160   :  { %271 = vsyncpa [#allocation3], 1 }
 0x161   :  { %272 = vsyncpa [#allocation4], 1 }

</bundles_post_ra>
